<compile_context>
chip_gen: v7x
topology: tpu7x:2x2x1
jax: 0.10.0
libtpu: 0.0.40
codegen_flags: <defaults>
</compile_context>

<pallas_src>
import functools

import numpy as np
import jax
import jax.numpy as jnp
from jax.experimental import pallas as pl
from jax.experimental.pallas import tpu as pltpu


def _round_up(x, m):
    return (x + m - 1) // m * m


def _silu(x):
    # explicit form used by both kernel and reference so they match bit-for-bit
    return x * (1.0 / (1.0 + jnp.exp(-x)))


# ----------------------------------------------------------------------------
# Kernel
# ----------------------------------------------------------------------------
def _layer_compute(h, knots, w_pack, aff, *, in_dim, n_int0, inv_levels):
    """One KAN layer on a row tile.

    h      : (tn, >= in_dim) f32 activations (only the first in_dim lanes used)
    knots  : (k+2, n_int0*in_dim) lane-packed knot rows
             row 0      -> g[j]          (block j spans in_dim lanes)
             row 1+kk   -> g[j+kk+1]     (kk = 0..k)
    w_pack : ((n_int0+1)*in_dim, out_pad) packed [base | spline_0..spline_*] weights
    aff    : (2, out_pad) affine (row 0 = scale, row 1 = bias)
    inv_levels : static tuple, inv_levels[kk-1] = 1/(kk*h_grid)  (uniform grid)
    """
    x = h[:, :in_dim]                                    # (tn, in_dim)
    # Replicate x across interval blocks on the lane axis (one wide slab instead
    # of ~27 narrow tensors).  Concatenate (not reshape) for safe Mosaic lowering.
    x_rep = jnp.concatenate([x] * n_int0, axis=-1)       # (tn, n_int0*in_dim)

    lo = knots[0:1, :]                                   # g[j]
    hi = knots[1:2, :]                                   # g[j+1]
    # order-0 basis: half-open indicator, identical to pykan B_batch
    b = ((x_rep >= lo) & (x_rep < hi)).astype(jnp.float32)

    x_minus_lo = x_rep - lo                              # reused every level
    zero_blk = jnp.zeros_like(x)                         # (tn, in_dim)

    # Cox-de Boor recursion; denominators are compile-time constants (uniform
    # grid), so each level is a few wide VPU ops + one lane shift.
    for kk in range(1, len(inv_levels) + 1):
        b_next = jnp.concatenate([b[:, in_dim:], zero_blk], axis=-1)   # b[j+1]
        hi_kk = knots[kk + 1:kk + 2, :]                                # g[j+kk+1]
        b = (x_minus_lo * b + (hi_kk - x_rep) * b_next) * inv_levels[kk - 1]
    # valid basis values now live in the first (n_int0 - k)*in_dim lanes; the
    # garbage tail blocks are masked by zero rows in w_pack.

    # Fused contraction: [silu(x) | basis slab] @ packed weights (single MXU op).
    feat = jnp.concatenate([_silu(x), b], axis=-1)       # (tn, (n_int0+1)*in_dim)
    y = jnp.dot(feat.astype(w_pack.dtype), w_pack,
                preferred_element_type=jnp.float32)      # (tn, out_pad)
    return y * aff[0:1, :] + aff[1:2, :]


def kan_fused_kernel(x_ref, *rest, in_dims, n_int0, inv_levels):
    o_ref = rest[-1]
    layer_refs = rest[:-1]                                # 3 refs per layer
    h = x_ref[...].astype(jnp.float32)
    for l in range(len(in_dims)):
        knots_ref, w_ref, aff_ref = layer_refs[3 * l:3 * l + 3]
        h = _layer_compute(h, knots_ref[...], w_ref[...], aff_ref[...],
                           in_dim=in_dims[l], n_int0=n_int0,
                           inv_levels=inv_levels)
    o_ref[...] = h.astype(o_ref.dtype)


# ----------------------------------------------------------------------------
# Host-side parameter packing & wrapper
# ----------------------------------------------------------------------------
def init_kan_params(width, *, grid=21, k=3, grid_range=(0.0, 1.0), seed=1):
    """Deterministic synthetic pykan-style parameters (raw, un-packed)."""
    G = grid
    gh = (grid_range[1] - grid_range[0]) / G
    pts = (grid_range[0] + gh * np.arange(-k, G + k + 1)).astype(np.float32)  # (G+2k+1,)
    key = jax.random.PRNGKey(seed)
    layers = []
    for l in range(len(width) - 1):
        in_dim, out_dim = width[l], width[l + 1]
        key, k1, k2 = jax.random.split(key, 3)
        layers.append(dict(
            coef=0.1 * jax.random.normal(k1, (in_dim, out_dim, G + k), jnp.float32),
            scale_base=(1.0 / np.sqrt(in_dim))
                       * jax.random.normal(k2, (in_dim, out_dim), jnp.float32),
            scale_sp=jnp.ones((in_dim, out_dim), jnp.float32),
            mask=jnp.ones((in_dim, out_dim), jnp.float32),
            subnode_scale=jnp.ones((out_dim,), jnp.float32),
            subnode_bias=jnp.zeros((out_dim,), jnp.float32),
            node_scale=jnp.ones((out_dim,), jnp.float32),
            node_bias=jnp.zeros((out_dim,), jnp.float32),
        ))
    return layers, pts, float(gh)


def pack_kan_params(layers, pts, *, k, lane_pad=128, mxu_dtype=jnp.float32):
    """Pack raw params into the fused-kernel layout.

    Per layer:
      w_pack : ((n_int0+1)*in_dim, out_pad)  rows [0:in) = base weights,
               rows [(1+c)*in:(2+c)*in) = spline weights for basis c, zero tail.
      aff    : (2, out_pad)   row 0 = node*subnode scale, row 1 = folded bias.
      knots  : (k+2, n_int0*in_dim)  lane-packed grid rows.
    `mxu_dtype=jnp.bfloat16` halves weight bytes / feeds the MXU in bf16 on
    v6e/v7x (accumulation stays f32); default f32 keeps the tight self-test.
    """
    n_pts = pts.shape[0]
    n_int0 = n_pts - 1            # order-0 intervals = G + 2k
    n_basis = n_int0 - k          # G + k
    gh = float(pts[1] - pts[0])
    # extrapolated knots only feed garbage blocks (never read through nonzero weights)
    pts_ext = np.concatenate(
        [pts, pts[-1] + gh * np.arange(1, k + 1)]).astype(np.float32)

    packed = []
    for layer in layers:
        in_dim, out_dim = layer["scale_base"].shape
        out_pad = _round_up(out_dim, lane_pad)

        w_base = np.asarray(layer["scale_base"] * layer["mask"], np.float32)
        coef_eff = np.asarray(
            layer["coef"] * (layer["scale_sp"] * layer["mask"])[:, :, None], np.float32)

        K = (n_int0 + 1) * in_dim
        w_pack = np.zeros((K, out_pad), np.float32)
        w_pack[:in_dim, :out_dim] = w_base
        for c in range(n_basis):
            w_pack[(1 + c) * in_dim:(2 + c) * in_dim, :out_dim] = coef_eff[:, :, c]

        scale = np.asarray(layer["node_scale"] * layer["subnode_scale"], np.float32)
        bias = np.asarray(layer["node_scale"] * layer["subnode_bias"]
                          + layer["node_bias"], np.float32)
        aff = np.zeros((2, out_pad), np.float32)
        aff[0, :out_dim] = scale
        aff[1, :out_dim] = bias

        knots = np.zeros((k + 2, n_int0 * in_dim), np.float32)
        knots[0] = np.repeat(pts_ext[0:n_int0], in_dim)                       # g[j]
        for kk in range(0, k + 1):
            knots[1 + kk] = np.repeat(pts_ext[kk + 1:kk + 1 + n_int0], in_dim)  # g[j+kk+1]

        packed.append(dict(
            in_dim=in_dim, out_dim=out_dim, out_pad=out_pad,
            knots=jnp.asarray(knots),
            w_pack=jnp.asarray(w_pack, dtype=mxu_dtype),
            aff=jnp.asarray(aff),
        ))
    inv_levels = tuple(float(1.0 / (kk * gh)) for kk in range(1, k + 1))
    return packed, n_int0, inv_levels


def kan_encoder_forward(x, packed, n_int0, inv_levels, *, tn=256,
                        vmem_limit_bytes=48 * 1024 * 1024):
    """x: (B, T, F) -> (B, T, width[-1]).  Rows flattened like the torch module."""
    B, T, F = x.shape
    h = x.reshape(B * T, F).astype(jnp.float32)
    n = h.shape[0]
    out_dim = packed[-1]["out_dim"]
    out_pad = packed[-1]["out_pad"]

    tn = max(8, _round_up(min(tn, _round_up(n, 8)), 8))
    n_pad = _round_up(n, tn)
    if n_pad != n:
        h = jnp.concatenate([h, jnp.zeros((n_pad - n, F), h.dtype)], axis=0)

    in_specs = [pl.BlockSpec((tn, F), lambda i: (i, 0))]
    inputs = [h]
    for p in packed:
        for name in ("knots", "w_pack", "aff"):
            arr = p[name]
            in_specs.append(pl.BlockSpec(arr.shape, lambda i: (0, 0)))  # resident
            inputs.append(arr)

    kernel = functools.partial(
        kan_fused_kernel,
        in_dims=tuple(p["in_dim"] for p in packed),
        n_int0=n_int0,
        inv_levels=inv_levels,
    )
    out = pl.pallas_call(
        kernel,
        out_shape=jax.ShapeDtypeStruct((n_pad, out_pad), jnp.float32),
        grid_spec=pltpu.PrefetchScalarGridSpec(
            num_scalar_prefetch=0,
            grid=(n_pad // tn,),
            in_specs=in_specs,
            out_specs=pl.BlockSpec((tn, out_pad), lambda i: (i, 0)),
        ),
        compiler_params=pltpu.CompilerParams(
            dimension_semantics=("parallel",),        # shards rows across TCs on v7x
            vmem_limit_bytes=vmem_limit_bytes,        # < 64 MiB physical on v7x
        ),
    )(*inputs)
    return out[:n, :out_dim].reshape(B, T, out_dim)


# ----------------------------------------------------------------------------
# Pure-JAX reference (original pykan B_batch formulation, unfused, with divides)
# ----------------------------------------------------------------------------
def kan_encoder_ref(x, layers, pts, *, k):
    B, T, F = x.shape
    h = x.reshape(B * T, F).astype(jnp.float32)
    g = jnp.asarray(pts)[None, None, :]                  # same grid per feature at init
    for layer in layers:
        xg = h[:, :, None]                               # (n, in, 1)
        b = ((xg >= g[:, :, :-1]) & (xg < g[:, :, 1:])).astype(jnp.float32)
        for kk in range(1, k + 1):
            b = ((xg - g[:, :, :-(kk + 1)])
                 / (g[:, :, kk:-1] - g[:, :, :-(kk + 1)]) * b[:, :, :-1]
                 + (g[:, :, kk + 1:] - xg)
                 / (g[:, :, kk + 1:] - g[:, :, 1:-kk]) * b[:, :, 1:])
        base = _silu(h)
        w_base = layer["scale_base"] * layer["mask"]
        coef_eff = layer["coef"] * (layer["scale_sp"] * layer["mask"])[:, :, None]
        y = base @ w_base + jnp.einsum("nic,ioc->no", b, coef_eff)
        scale = (layer["node_scale"] * layer["subnode_scale"])[None, :]
        bias = (layer["node_scale"] * layer["subnode_bias"] + layer["node_bias"])[None, :]
        h = y * scale + bias
    return h.reshape(B, T, -1)


# TODO(synk): pykan's symbolic_fun branch (zero-masked at init) and save_act
# activation caching have no compute effect on forward() and are omitted.
# TODO(synk): update_grid() produces non-uniform per-feature grids; that path
# would need the division-based recursion with a per-feature grid input.


if __name__ == "__main__":
    B, T, F = 2, 8, 8
    width = [F, 32, 16]
    grid_n, k = 21, 3

    x = jax.random.uniform(jax.random.PRNGKey(0), (B, T, F), dtype=jnp.float32)
    layers, pts, gh = init_kan_params(width, grid=grid_n, k=k,
                                      grid_range=(0.0, 1.0), seed=1)
    packed, n_int0, inv_levels = pack_kan_params(layers, pts, k=k)

    out = kan_encoder_forward(x, packed, n_int0, inv_levels, tn=256)
    out = jax.block_until_ready(out)

    ref = kan_encoder_ref(x, layers, pts, k=k)
    assert out.shape == (B, T, width[-1]), out.shape
    err = float(jnp.max(jnp.abs(out - ref)))
    assert jnp.allclose(out, ref, rtol=1e-4, atol=1e-4), err

    print("KERNEL_OK")
</pallas_src>

<mosaic_0001>
module attributes {stable_mosaic.version = 11 : i64} {
  func.func @kan_fused_kernel(%arg0: i32, %arg1: memref<16x8xf32, #tpu.memory_space<vmem>>, %arg2: memref<5x216xf32, #tpu.memory_space<vmem>>, %arg3: memref<224x128xf32, #tpu.memory_space<vmem>>, %arg4: memref<2x128xf32, #tpu.memory_space<vmem>>, %arg5: memref<5x864xf32, #tpu.memory_space<vmem>>, %arg6: memref<896x128xf32, #tpu.memory_space<vmem>>, %arg7: memref<2x128xf32, #tpu.memory_space<vmem>>, %arg8: memref<16x128xf32, #tpu.memory_space<vmem>>) attributes {dimension_semantics = [#tpu.dimension_semantics<parallel>], iteration_bounds = array<i64: 1>, scalar_prefetch = 0 : i64, scratch_operands = 0 : i64, tpu.core_type = #tpu.core_type<tc>, window_params = [{transform_indices = @transform_0, window_bounds = array<i64: 16, 8>}, {pipeline_mode = #tpu.pipeline_mode<synchronous>, transform_indices = @transform_1, window_bounds = array<i64: 5, 216>}, {pipeline_mode = #tpu.pipeline_mode<synchronous>, transform_indices = @transform_2, window_bounds = array<i64: 224, 128>}, {pipeline_mode = #tpu.pipeline_mode<synchronous>, transform_indices = @transform_3, window_bounds = array<i64: 2, 128>}, {pipeline_mode = #tpu.pipeline_mode<synchronous>, transform_indices = @transform_4, window_bounds = array<i64: 5, 864>}, {pipeline_mode = #tpu.pipeline_mode<synchronous>, transform_indices = @transform_5, window_bounds = array<i64: 896, 128>}, {pipeline_mode = #tpu.pipeline_mode<synchronous>, transform_indices = @transform_6, window_bounds = array<i64: 2, 128>}, {transform_indices = @transform_7, window_bounds = array<i64: 16, 128>}]} {
    %c0 = arith.constant 0 : index
    %c0_0 = arith.constant 0 : index
    %0 = vector.load %arg1[%c0, %c0_0] : memref<16x8xf32, #tpu.memory_space<vmem>>, vector<16x8xf32>
    %c0_1 = arith.constant 0 : index
    %c0_2 = arith.constant 0 : index
    %1 = vector.load %arg2[%c0_1, %c0_2] : memref<5x216xf32, #tpu.memory_space<vmem>>, vector<5x216xf32>
    %c0_3 = arith.constant 0 : index
    %c0_4 = arith.constant 0 : index
    %2 = vector.load %arg3[%c0_3, %c0_4] : memref<224x128xf32, #tpu.memory_space<vmem>>, vector<224x128xf32>
    %c0_5 = arith.constant 0 : index
    %c0_6 = arith.constant 0 : index
    %3 = vector.load %arg4[%c0_5, %c0_6] : memref<2x128xf32, #tpu.memory_space<vmem>>, vector<2x128xf32>
    %4 = tpu.concatenate %0, %0, %0, %0, %0, %0, %0, %0, %0, %0, %0, %0, %0, %0, %0, %0 in 1 : vector<16x8xf32>, vector<16x8xf32>, vector<16x8xf32>, vector<16x8xf32>, vector<16x8xf32>, vector<16x8xf32>, vector<16x8xf32>, vector<16x8xf32>, vector<16x8xf32>, vector<16x8xf32>, vector<16x8xf32>, vector<16x8xf32>, vector<16x8xf32>, vector<16x8xf32>, vector<16x8xf32>, vector<16x8xf32> -> vector<16x128xf32>
    %5 = tpu.concatenate %0, %0, %0, %0, %0, %0, %0, %0, %0, %0, %0 in 1 : vector<16x8xf32>, vector<16x8xf32>, vector<16x8xf32>, vector<16x8xf32>, vector<16x8xf32>, vector<16x8xf32>, vector<16x8xf32>, vector<16x8xf32>, vector<16x8xf32>, vector<16x8xf32>, vector<16x8xf32> -> vector<16x88xf32>
    %6 = tpu.concatenate %4, %5 in 1 : vector<16x128xf32>, vector<16x88xf32> -> vector<16x216xf32>
    %7 = vector.extract_strided_slice %1 {offsets = [0, 0], sizes = [1, 216], strides = [1, 1]} : vector<5x216xf32> to vector<1x216xf32>
    %8 = vector.extract_strided_slice %1 {offsets = [1, 0], sizes = [1, 216], strides = [1, 1]} : vector<5x216xf32> to vector<1x216xf32>
    %9 = vector.broadcast %7 : vector<1x216xf32> to vector<16x216xf32>
    %10 = arith.cmpf oge, %6, %9 : vector<16x216xf32>
    %11 = vector.broadcast %8 : vector<1x216xf32> to vector<16x216xf32>
    %12 = arith.cmpf olt, %6, %11 : vector<16x216xf32>
    %13 = arith.andi %10, %12 : vector<16x216xi1>
    %14 = arith.extui %13 : vector<16x216xi1> to vector<16x216xi32>
    %15 = arith.sitofp %14 : vector<16x216xi32> to vector<16x216xf32>
    %16 = vector.broadcast %7 : vector<1x216xf32> to vector<16x216xf32>
    %17 = arith.subf %6, %16 : vector<16x216xf32>
    %cst = arith.constant 0.000000e+00 : f32
    %18 = vector.broadcast %cst : f32 to vector<16x8xf32>
    %19 = vector.extract_strided_slice %15 {offsets = [0, 8], sizes = [16, 208], strides = [1, 1]} : vector<16x216xf32> to vector<16x208xf32>
    %20 = tpu.concatenate %19, %18 in 1 : vector<16x208xf32>, vector<16x8xf32> -> vector<16x216xf32>
    %21 = vector.extract_strided_slice %1 {offsets = [2, 0], sizes = [1, 216], strides = [1, 1]} : vector<5x216xf32> to vector<1x216xf32>
    %22 = arith.mulf %17, %15 : vector<16x216xf32>
    %23 = vector.broadcast %21 : vector<1x216xf32> to vector<16x216xf32>
    %24 = arith.subf %23, %6 : vector<16x216xf32>
    %25 = arith.mulf %24, %20 : vector<16x216xf32>
    %26 = arith.addf %22, %25 : vector<16x216xf32>
    %cst_7 = arith.constant 20.9999981 : f32
    %27 = vector.broadcast %cst_7 : f32 to vector<16x216xf32>
    %28 = arith.mulf %26, %27 : vector<16x216xf32>
    %29 = vector.extract_strided_slice %28 {offsets = [0, 8], sizes = [16, 208], strides = [1, 1]} : vector<16x216xf32> to vector<16x208xf32>
    %30 = tpu.concatenate %29, %18 in 1 : vector<16x208xf32>, vector<16x8xf32> -> vector<16x216xf32>
    %31 = vector.extract_strided_slice %1 {offsets = [3, 0], sizes = [1, 216], strides = [1, 1]} : vector<5x216xf32> to vector<1x216xf32>
    %32 = arith.mulf %17, %28 : vector<16x216xf32>
    %33 = vector.broadcast %31 : vector<1x216xf32> to vector<16x216xf32>
    %34 = arith.subf %33, %6 : vector<16x216xf32>
    %35 = arith.mulf %34, %30 : vector<16x216xf32>
    %36 = arith.addf %32, %35 : vector<16x216xf32>
    %cst_8 = arith.constant 10.499999 : f32
    %37 = vector.broadcast %cst_8 : f32 to vector<16x216xf32>
    %38 = arith.mulf %36, %37 : vector<16x216xf32>
    %39 = vector.extract_strided_slice %38 {offsets = [0, 8], sizes = [16, 208], strides = [1, 1]} : vector<16x216xf32> to vector<16x208xf32>
    %40 = tpu.concatenate %39, %18 in 1 : vector<16x208xf32>, vector<16x8xf32> -> vector<16x216xf32>
    %41 = vector.extract_strided_slice %1 {offsets = [4, 0], sizes = [1, 216], strides = [1, 1]} : vector<5x216xf32> to vector<1x216xf32>
    %42 = arith.mulf %17, %38 : vector<16x216xf32>
    %43 = vector.broadcast %41 : vector<1x216xf32> to vector<16x216xf32>
    %44 = arith.subf %43, %6 : vector<16x216xf32>
    %45 = arith.mulf %44, %40 : vector<16x216xf32>
    %46 = arith.addf %42, %45 : vector<16x216xf32>
    %cst_9 = arith.constant 6.99999952 : f32
    %47 = vector.broadcast %cst_9 : f32 to vector<16x216xf32>
    %48 = arith.mulf %46, %47 : vector<16x216xf32>
    %cst_10 = arith.constant 0.000000e+00 : f32
    %49 = vector.broadcast %cst_10 : f32 to vector<16x8xf32>
    %50 = arith.subf %49, %0 : vector<16x8xf32>
    %51 = math.exp %50 : vector<16x8xf32>
    %cst_11 = arith.constant 1.000000e+00 : f32
    %52 = vector.broadcast %cst_11 : f32 to vector<16x8xf32>
    %53 = arith.addf %52, %51 : vector<16x8xf32>
    %cst_12 = arith.constant 1.000000e+00 : f32
    %54 = vector.broadcast %cst_12 : f32 to vector<16x8xf32>
    %55 = arith.divf %54, %53 : vector<16x8xf32>
    %56 = arith.mulf %0, %55 : vector<16x8xf32>
    %57 = tpu.concatenate %56, %48 in 1 : vector<16x8xf32>, vector<16x216xf32> -> vector<16x224xf32>
    %cst_13 = arith.constant dense<0.000000e+00> : vector<16x128xf32>
    %58 = tpu.matmul %57, %2, %cst_13 {dimension_numbers = #tpu.dot_dimension_numbers<[1], [0], [0], [1], [0, 0, 1, 1], [], []>} : vector<16x224xf32>, vector<224x128xf32>, vector<16x128xf32> -> vector<16x128xf32>
    %59 = vector.extract_strided_slice %3 {offsets = [0, 0], sizes = [1, 128], strides = [1, 1]} : vector<2x128xf32> to vector<1x128xf32>
    %60 = vector.broadcast %59 : vector<1x128xf32> to vector<16x128xf32>
    %61 = arith.mulf %58, %60 : vector<16x128xf32>
    %62 = vector.extract_strided_slice %3 {offsets = [1, 0], sizes = [1, 128], strides = [1, 1]} : vector<2x128xf32> to vector<1x128xf32>
    %63 = vector.broadcast %62 : vector<1x128xf32> to vector<16x128xf32>
    %64 = arith.addf %61, %63 : vector<16x128xf32>
    %c0_14 = arith.constant 0 : index
    %c0_15 = arith.constant 0 : index
    %65 = vector.load %arg5[%c0_14, %c0_15] : memref<5x864xf32, #tpu.memory_space<vmem>>, vector<5x864xf32>
    %c0_16 = arith.constant 0 : index
    %c0_17 = arith.constant 0 : index
    %66 = vector.load %arg6[%c0_16, %c0_17] : memref<896x128xf32, #tpu.memory_space<vmem>>, vector<896x128xf32>
    %c0_18 = arith.constant 0 : index
    %c0_19 = arith.constant 0 : index
    %67 = vector.load %arg7[%c0_18, %c0_19] : memref<2x128xf32, #tpu.memory_space<vmem>>, vector<2x128xf32>
    %68 = vector.extract_strided_slice %64 {offsets = [0, 0], sizes = [16, 32], strides = [1, 1]} : vector<16x128xf32> to vector<16x32xf32>
    %69 = tpu.concatenate %68, %68, %68, %68, %68, %68, %68, %68, %68, %68, %68, %68, %68, %68, %68, %68 in 1 : vector<16x32xf32>, vector<16x32xf32>, vector<16x32xf32>, vector<16x32xf32>, vector<16x32xf32>, vector<16x32xf32>, vector<16x32xf32>, vector<16x32xf32>, vector<16x32xf32>, vector<16x32xf32>, vector<16x32xf32>, vector<16x32xf32>, vector<16x32xf32>, vector<16x32xf32>, vector<16x32xf32>, vector<16x32xf32> -> vector<16x512xf32>
    %70 = tpu.concatenate %68, %68, %68, %68, %68, %68, %68, %68, %68, %68, %68 in 1 : vector<16x32xf32>, vector<16x32xf32>, vector<16x32xf32>, vector<16x32xf32>, vector<16x32xf32>, vector<16x32xf32>, vector<16x32xf32>, vector<16x32xf32>, vector<16x32xf32>, vector<16x32xf32>, vector<16x32xf32> -> vector<16x352xf32>
    %71 = tpu.concatenate %69, %70 in 1 : vector<16x512xf32>, vector<16x352xf32> -> vector<16x864xf32>
    %72 = vector.extract_strided_slice %65 {offsets = [0, 0], sizes = [1, 864], strides = [1, 1]} : vector<5x864xf32> to vector<1x864xf32>
    %73 = vector.extract_strided_slice %65 {offsets = [1, 0], sizes = [1, 864], strides = [1, 1]} : vector<5x864xf32> to vector<1x864xf32>
    %74 = vector.broadcast %72 : vector<1x864xf32> to vector<16x864xf32>
    %75 = arith.cmpf oge, %71, %74 : vector<16x864xf32>
    %76 = vector.broadcast %73 : vector<1x864xf32> to vector<16x864xf32>
    %77 = arith.cmpf olt, %71, %76 : vector<16x864xf32>
    %78 = arith.andi %75, %77 : vector<16x864xi1>
    %79 = arith.extui %78 : vector<16x864xi1> to vector<16x864xi32>
    %80 = arith.sitofp %79 : vector<16x864xi32> to vector<16x864xf32>
    %81 = vector.broadcast %72 : vector<1x864xf32> to vector<16x864xf32>
    %82 = arith.subf %71, %81 : vector<16x864xf32>
    %cst_20 = arith.constant 0.000000e+00 : f32
    %83 = vector.broadcast %cst_20 : f32 to vector<16x32xf32>
    %84 = vector.extract_strided_slice %80 {offsets = [0, 32], sizes = [16, 832], strides = [1, 1]} : vector<16x864xf32> to vector<16x832xf32>
    %85 = tpu.concatenate %84, %83 in 1 : vector<16x832xf32>, vector<16x32xf32> -> vector<16x864xf32>
    %86 = vector.extract_strided_slice %65 {offsets = [2, 0], sizes = [1, 864], strides = [1, 1]} : vector<5x864xf32> to vector<1x864xf32>
    %87 = arith.mulf %82, %80 : vector<16x864xf32>
    %88 = vector.broadcast %86 : vector<1x864xf32> to vector<16x864xf32>
    %89 = arith.subf %88, %71 : vector<16x864xf32>
    %90 = arith.mulf %89, %85 : vector<16x864xf32>
    %91 = arith.addf %87, %90 : vector<16x864xf32>
    %cst_21 = arith.constant 20.9999981 : f32
    %92 = vector.broadcast %cst_21 : f32 to vector<16x864xf32>
    %93 = arith.mulf %91, %92 : vector<16x864xf32>
    %94 = vector.extract_strided_slice %93 {offsets = [0, 32], sizes = [16, 832], strides = [1, 1]} : vector<16x864xf32> to vector<16x832xf32>
    %95 = tpu.concatenate %94, %83 in 1 : vector<16x832xf32>, vector<16x32xf32> -> vector<16x864xf32>
    %96 = vector.extract_strided_slice %65 {offsets = [3, 0], sizes = [1, 864], strides = [1, 1]} : vector<5x864xf32> to vector<1x864xf32>
    %97 = arith.mulf %82, %93 : vector<16x864xf32>
    %98 = vector.broadcast %96 : vector<1x864xf32> to vector<16x864xf32>
    %99 = arith.subf %98, %71 : vector<16x864xf32>
    %100 = arith.mulf %99, %95 : vector<16x864xf32>
    %101 = arith.addf %97, %100 : vector<16x864xf32>
    %cst_22 = arith.constant 10.499999 : f32
    %102 = vector.broadcast %cst_22 : f32 to vector<16x864xf32>
    %103 = arith.mulf %101, %102 : vector<16x864xf32>
    %104 = vector.extract_strided_slice %103 {offsets = [0, 32], sizes = [16, 832], strides = [1, 1]} : vector<16x864xf32> to vector<16x832xf32>
    %105 = tpu.concatenate %104, %83 in 1 : vector<16x832xf32>, vector<16x32xf32> -> vector<16x864xf32>
    %106 = vector.extract_strided_slice %65 {offsets = [4, 0], sizes = [1, 864], strides = [1, 1]} : vector<5x864xf32> to vector<1x864xf32>
    %107 = arith.mulf %82, %103 : vector<16x864xf32>
    %108 = vector.broadcast %106 : vector<1x864xf32> to vector<16x864xf32>
    %109 = arith.subf %108, %71 : vector<16x864xf32>
    %110 = arith.mulf %109, %105 : vector<16x864xf32>
    %111 = arith.addf %107, %110 : vector<16x864xf32>
    %cst_23 = arith.constant 6.99999952 : f32
    %112 = vector.broadcast %cst_23 : f32 to vector<16x864xf32>
    %113 = arith.mulf %111, %112 : vector<16x864xf32>
    %cst_24 = arith.constant 0.000000e+00 : f32
    %114 = vector.broadcast %cst_24 : f32 to vector<16x32xf32>
    %115 = arith.subf %114, %68 : vector<16x32xf32>
    %116 = math.exp %115 : vector<16x32xf32>
    %cst_25 = arith.constant 1.000000e+00 : f32
    %117 = vector.broadcast %cst_25 : f32 to vector<16x32xf32>
    %118 = arith.addf %117, %116 : vector<16x32xf32>
    %cst_26 = arith.constant 1.000000e+00 : f32
    %119 = vector.broadcast %cst_26 : f32 to vector<16x32xf32>
    %120 = arith.divf %119, %118 : vector<16x32xf32>
    %121 = arith.mulf %68, %120 : vector<16x32xf32>
    %122 = tpu.concatenate %121, %113 in 1 : vector<16x32xf32>, vector<16x864xf32> -> vector<16x896xf32>
    %cst_27 = arith.constant dense<0.000000e+00> : vector<16x128xf32>
    %123 = tpu.matmul %122, %66, %cst_27 {dimension_numbers = #tpu.dot_dimension_numbers<[1], [0], [0], [1], [0, 0, 1, 1], [], []>} : vector<16x896xf32>, vector<896x128xf32>, vector<16x128xf32> -> vector<16x128xf32>
    %124 = vector.extract_strided_slice %67 {offsets = [0, 0], sizes = [1, 128], strides = [1, 1]} : vector<2x128xf32> to vector<1x128xf32>
    %125 = vector.broadcast %124 : vector<1x128xf32> to vector<16x128xf32>
    %126 = arith.mulf %123, %125 : vector<16x128xf32>
    %127 = vector.extract_strided_slice %67 {offsets = [1, 0], sizes = [1, 128], strides = [1, 1]} : vector<2x128xf32> to vector<1x128xf32>
    %128 = vector.broadcast %127 : vector<1x128xf32> to vector<16x128xf32>
    %129 = arith.addf %126, %128 : vector<16x128xf32>
    %c0_28 = arith.constant 0 : index
    %c0_29 = arith.constant 0 : index
    %130 = vector.load %arg8[%c0_28, %c0_29] : memref<16x128xf32, #tpu.memory_space<vmem>>, vector<16x128xf32>
    tpu.vector_store %arg8[%c0_28, %c0_29], %129 {strides = array<i32>} : memref<16x128xf32, #tpu.memory_space<vmem>>, vector<16x128xf32>,
    return
  }
  func.func @transform_0(%arg0: i32) -> (i32, i32) {
    %c0_i32 = arith.constant 0 : i32
    %c0_i32_0 = arith.constant 0 : i32
    return %arg0, %c0_i32 : i32, i32
  }
  func.func @transform_1(%arg0: i32) -> (i32, i32) {
    %c0_i32 = arith.constant 0 : i32
    %c0_i32_0 = arith.constant 0 : i32
    %c0_i32_1 = arith.constant 0 : i32
    return %c0_i32, %c0_i32_0 : i32, i32
  }
  func.func @transform_2(%arg0: i32) -> (i32, i32) {
    %c0_i32 = arith.constant 0 : i32
    %c0_i32_0 = arith.constant 0 : i32
    %c0_i32_1 = arith.constant 0 : i32
    return %c0_i32, %c0_i32_0 : i32, i32
  }
  func.func @transform_3(%arg0: i32) -> (i32, i32) {
    %c0_i32 = arith.constant 0 : i32
    %c0_i32_0 = arith.constant 0 : i32
    %c0_i32_1 = arith.constant 0 : i32
    return %c0_i32, %c0_i32_0 : i32, i32
  }
  func.func @transform_4(%arg0: i32) -> (i32, i32) {
    %c0_i32 = arith.constant 0 : i32
    %c0_i32_0 = arith.constant 0 : i32
    %c0_i32_1 = arith.constant 0 : i32
    return %c0_i32, %c0_i32_0 : i32, i32
  }
  func.func @transform_5(%arg0: i32) -> (i32, i32) {
    %c0_i32 = arith.constant 0 : i32
    %c0_i32_0 = arith.constant 0 : i32
    %c0_i32_1 = arith.constant 0 : i32
    return %c0_i32, %c0_i32_0 : i32, i32
  }
  func.func @transform_6(%arg0: i32) -> (i32, i32) {
    %c0_i32 = arith.constant 0 : i32
    %c0_i32_0 = arith.constant 0 : i32
    %c0_i32_1 = arith.constant 0 : i32
    return %c0_i32, %c0_i32_0 : i32, i32
  }
  func.func @transform_7(%arg0: i32) -> (i32, i32) {
    %c0_i32 = arith.constant 0 : i32
    %c0_i32_0 = arith.constant 0 : i32
    return %arg0, %c0_i32 : i32, i32
  }
}

</mosaic_0001>

<bundles_post_ra>
// kernel: tpu_custom_call.1
= control target key start
LH: loop header
LB: loop body
LE: loop exit
PB: predicated region body
PF: predicated region fallthrough
CT: control target
= control target key end

     0   :  { %12 = vsyncpa [#allocation3], 0  ;;  %s3594_s0 = inlined_call_operand.vmem [shape: f32[16,8], index: 0, kind: input, shape index: {}]   ;;  %s3595_s1 = inlined_call_operand.vmem [shape: f32[5,216], index: 1, kind: input, shape index: {}]   ;;  %s3596_s2 = inlined_call_operand.hbm [shape: f32[224,128], index: 2, kind: input, shape index: {}]   ;;  %s3597_s3 = inlined_call_operand.vmem [shape: f32[2,128], index: 3, kind: input, shape index: {}]   ;;  %s3598_s4 = inlined_call_operand.hbm [shape: f32[5,864], index: 4, kind: input, shape index: {}]   ;;  %s3599_s5 = inlined_call_operand.hbm [shape: f32[896,128], index: 5, kind: input, shape index: {}]   ;;  %s3600_s6 = inlined_call_operand.vmem [shape: f32[2,128], index: 6, kind: input, shape index: {}]   ;;  %s3601_s7 = inlined_call_operand.hbm [shape: f32[16,128], index: 7, kind: output, shape index: {}]  }
   0x1   :  { %13 = vsyncpa [#allocation6], 0 }
   0x2   :  { %14 = vsyncpa [#allocation4], 0  ;;  %s2313_s24 = smov [#allocation5]   ;;  %s2314_s26 = smov [#allocation2]  }
   0x3   :  { %s39_s25 = sshll.u32 %s2313_s24, 4  ;;  %s24_s27 = sshll.u32 %s2314_s26, 4  ;;  %s40_s25 = int_to_ptr.vmem [resolvable:$true] %s39_s25  ;;  %s2375_s27 = int_to_ptr.vmem [resolvable:$true] %s24_s27 }
   0x4   :  { %s2219_s30 = scalar_lea.hbm %s3598_s4, 896 }
   0x5   :  { %p2220_p0 = scmp.ne.s32.totalorder %s3598_s4, %s2219_s30  ;;  %p2223_p1 = scmp.lt.u32.totalorder %s2219_s30, %s3598_s4 }
   0x7   :  { %p2225_p2 = pnand %p2223_p1, %p2220_p0 }
   0x9   :  { %2228 = shalt.err (!%p2225_p2)
}
   0xa   :  { %s2229_s12 = scalar_lea.vmem %s40_s25, 896  ;;  %p2234_p4 = scmp.lt.s32.totalorder %s40_s25, %s40_s25 }
   0xb   :  { %p2230_p3 = scmp.ne.s32.totalorder %s40_s25, %s2229_s12  ;;  %p2235_p5 = scmp.lt.s32.totalorder %s2229_s12, %s2229_s12 }
   0xd   :  { %p2236_p6 = por %p2235_p5, %p2234_p4 }
   0xf   :  { %p2237_p7 = pnand %p2236_p6, %p2230_p3 }
  0x11   :  { %2240 = shalt.err (!%p2237_p7)
}
  0x12   :  { %42 = dma.hbm_to_vmem [thread:$0]  %s3598_s4, 896, %s40_s25, [#allocation6]  }
  0x13   :  { %s2241_s17 = scalar_lea.hbm %s3596_s2, 3584 }
  0x14   :  { %p2242_p8 = scmp.ne.s32.totalorder %s3596_s2, %s2241_s17  ;;  %p2245_p9 = scmp.lt.u32.totalorder %s2241_s17, %s3596_s2 }
  0x16   :  { %p2247_p10 = pnand %p2245_p9, %p2242_p8 }
  0x18   :  { %2250 = shalt.err (!%p2247_p10)
}
  0x19   :  { %s2251_s22 = scalar_lea.vmem %s2375_s27, 3584  ;;  %p2256_p12 = scmp.lt.s32.totalorder %s2375_s27, %s2375_s27 }
  0x1a   :  { %p2252_p11 = scmp.ne.s32.totalorder %s2375_s27, %s2251_s22  ;;  %p2257_p13 = scmp.lt.s32.totalorder %s2251_s22, %s2251_s22 }
  0x1c   :  { %p2258_p0 = por %p2257_p13, %p2256_p12 }
  0x1e   :  { %p2259_p1 = pnand %p2258_p0, %p2252_p11 }
  0x20   :  { %2262 = shalt.err (!%p2259_p1)
}
  0x21   :  { %s2315_s4 = smov 128   ;;  %s2316_s23 = smov 8  }
  0x22   :  { %30 = dma.hbm_to_vmem [thread:$0]  %s3596_s2, 3584, %s2375_s27, [#allocation3], %s2315_s4, %s2315_s4, %s2316_s23  }
  0x23   :  { %s2317_s26 = smov [#allocation7]   ;;  %s2263_s8 = scalar_lea.hbm %s3599_s5, 14336 }
  0x24   :  { %s48_s28 = sshll.u32 %s2317_s26, 4  ;;  %p2264_p2 = scmp.ne.s32.totalorder %s3599_s5, %s2263_s8  ;;  %s49_s28 = int_to_ptr.vmem [resolvable:$true] %s48_s28 }
  0x25   :  { %p2267_p3 = scmp.lt.u32.totalorder %s2263_s8, %s3599_s5 }
  0x27   :  { %p2269_p4 = pnand %p2267_p3, %p2264_p2 }
  0x29   :  { %2272 = shalt.err (!%p2269_p4)
}
  0x2a   :  { %s2273_s13 = scalar_lea.vmem %s49_s28, 14336  ;;  %p2278_p6 = scmp.lt.s32.totalorder %s49_s28, %s49_s28 }
  0x2b   :  { %p2274_p5 = scmp.ne.s32.totalorder %s49_s28, %s2273_s13  ;;  %p2279_p7 = scmp.lt.s32.totalorder %s2273_s13, %s2273_s13 }
  0x2d   :  { %p2280_p8 = por %p2279_p7, %p2278_p6 }
  0x2f   :  { %p2281_p9 = pnand %p2280_p8, %p2274_p5 }
  0x31   :  { %2284 = shalt.err (!%p2281_p9)
}
  0x32   :  { %54 = dma.hbm_to_vmem [thread:$0]  %s3599_s5, 14336, %s49_s28, [#allocation6], %s2315_s4, %s2315_s4, %s2316_s23  }
  0x33   :  { %2307 = dma.done.wait [#allocation3], 3584  }
  0x34   :  { %2308 = vsyncadd [#allocation3], 4294963712 }
  0x35   :  { %2309 = dma.done.wait [#allocation6], 15232  }
  0x36   :  { %2310 = vsyncadd [#allocation6], 4294952064  ;;  %v2427_v0 = vld [vmem:[%s3594_s0] sm:$0xff]  ;;  %s2318_s16 = smov 24   ;;  %s2319_s17 = smov 16   ;;  %v2451_v1 = vld [vmem:[%s3594_s0 + $0x8] sm:$0xff]  ;;  %v236_v4 = vlaneseq }
  0x37   :  { %101 = vrot.lane.b32.xlu0 %v2427_v0, %s2316_s23  ;;  %113 = vrot.lane.b32.xlu1 %v2427_v0, %s2318_s16  ;;  %s2320_s5 = smov 32   ;;  %s2321_s18 = smov 40   ;;  %vm191_vm0 = vcmask 64512   ;;  %vm194_vm1 = vcmask 130048   ;;  %vm197_vm2 = vcmask 195584   ;;  %vm200_vm3 = vcmask 261120  }
  0x38   :  { %s2322_s19 = smov 48   ;;  %s2323_s20 = smov 56   ;;  %vm203_vm4 = vcmask 326656   ;;  %v237_v11 = vshrl.u32 %v236_v4, 7  ;;  %vm206_vm5 = vcmask 392192   ;;  %vm209_vm6 = vcmask 457728  }
  0x39   :  { %s2324_s21 = smov 64   ;;  %s2325_s22 = smov 72   ;;  %v69_v20 = vld [vmem:[%s3595_s1 + $0x8] sm:$0x1f]  ;;  %vm212_vm7 = vcmask 523264   ;;  %vm3606_vm8 = vcmask 588800  }
  0x3a   :  { %s2326_s24 = smov 80   ;;  %s2327_s25 = smov 88   ;;  %v2482_v15 = vsub.s32 0, %v237_v11  ;;  %v2484_v16 = vsub.s32 2, %v237_v11  ;;  %v2490_v21 = vsub.s32 3, %v237_v11  ;;  %v2492_v22 = vsub.s32 4, %v237_v11 }
  0x3b   :  { %107 = vrot.lane.b32.xlu0 %v2427_v0, %s2319_s17  ;;  %119 = vrot.lane.b32.xlu1 %v2427_v0, %s2320_s5  ;;  %s2328_s26 = smov 96   ;;  %s2329_s28 = smov 104   ;;  %vm3605_vm9 = vcmask 654336   ;;  %vm3602_vm10 = vcmask 719872   ;;  %v2512_v33 = vsub.s32 1, %v237_v11  ;;  %vm3604_vm11 = vcmask 785408  }
  0x3c   :  { %s2330_s29 = smov 112   ;;  %s2331_s9 = smov 120   ;;  %3629 = vst [vmem:[#allocation12_spill] sm:$0xff] %v2482_v15  ;;  %v2496_v24 = vrot.slane %v69_v20, %v2482_v15  ;;  %v2499_v25 = vrot.slane %v69_v20, %v2484_v16  ;;  %v2503_v29 = vrot.slane %v69_v20, %v2490_v21  ;;  %v2506_v30 = vrot.slane %v69_v20, %v2492_v22  ;;  %v68_v41 = vld [vmem:[%s3595_s1] sm:$0x1f] }
  0x3d   :  { %3630 = vst [vmem:[#allocation13_spill] sm:$0xff] %v2512_v33  ;;  %vm3603_vm12 = vcmask 850944   ;;  %v2530_v42 = vrot.slane %v69_v20, %v2512_v33  ;;  %vm230_vm13 = vcmask 916480   ;;  %vm233_vm14 = vcmask 982016   ;;  %s2334_s27 = smov [#allocation8]  }
  0x3e   :  { %v2535_v47 = vrot.slane %v68_v41, %v2482_v15  ;;  %v251_v48 = vrot.slane %v68_v41, %v2512_v33  ;;  %v2543_v49 = vrot.slane %v68_v41, %v2484_v16  ;;  %v2546_v50 = vrot.slane %v68_v41, %v2490_v21  ;;  %s1736_s14 = sshll.u32 %s2334_s27, 4  ;;  %s1737_s14 = int_to_ptr.vmem [resolvable:$true] %s1736_s14 }
  0x3f   :  { %125 = vrot.lane.b32.xlu0 %v2427_v0, %s2321_s18  ;;  %131 = vrot.lane.b32.xlu1 %v2427_v0, %s2322_s19  ;;  %v2549_v51 = vrot.slane %v68_v41, %v2492_v22  ;;  %v2332_v63 = vmov 0.0   ;;  %s2285_s15 = scalar_lea.vmem %s1737_s14, 256  ;;  %p2290_p11 = scmp.lt.s32.totalorder %s1737_s14, %s1737_s14 }
  0x40   :  { %p2286_p10 = scmp.ne.s32.totalorder %s1737_s14, %s2285_s15  ;;  %p2291_p12 = scmp.lt.s32.totalorder %s2285_s15, %s2285_s15 }
  0x42   :  { %p2292_p13 = por %p2291_p12, %p2290_p11 }
  0x43   :  { %137 = vrot.lane.b32.xlu0 %v2427_v0, %s2323_s20  ;;  %143 = vrot.lane.b32.xlu1 %v2427_v0, %s2324_s21 }
  0x44   :  { %p2293_p0 = pnand %p2292_p13, %p2286_p10 }
  0x47   :  { %149 = vrot.lane.b32.xlu0 %v2427_v0, %s2325_s22  ;;  %155 = vrot.lane.b32.xlu1 %v2427_v0, %s2326_s24 }
  0x4b   :  { %161 = vrot.lane.b32.xlu0 %v2427_v0, %s2327_s25  ;;  %167 = vrot.lane.b32.xlu1 %v2427_v0, %s2328_s26 }
  0x4f   :  { %173 = vrot.lane.b32.xlu0 %v2427_v0, %s2329_s28  ;;  %179 = vrot.lane.b32.xlu1 %v2427_v0, %s2330_s29 }
  0x53   :  { %185 = vrot.lane.b32.xlu0 %v2427_v0, %s2331_s9  ;;  %103 = vrot.lane.b32.xlu1 %v2451_v1, %s2316_s23 }
  0x57   :  { %109 = vrot.lane.b32.xlu0 %v2451_v1, %s2319_s17  ;;  %115 = vrot.lane.b32.xlu1 %v2451_v1, %s2318_s16 }
  0x5b   :  { %121 = vrot.lane.b32.xlu0 %v2451_v1, %s2320_s5  ;;  %127 = vrot.lane.b32.xlu1 %v2451_v1, %s2321_s18 }
  0x5f   :  { %133 = vrot.lane.b32.xlu0 %v2451_v1, %s2322_s19  ;;  %139 = vrot.lane.b32.xlu1 %v2451_v1, %s2323_s20 }
  0x63   :  { %145 = vrot.lane.b32.xlu0 %v2451_v1, %s2324_s21  ;;  %151 = vrot.lane.b32.xlu1 %v2451_v1, %s2325_s22 }
  0x67   :  { %157 = vrot.lane.b32.xlu0 %v2451_v1, %s2326_s24  ;;  %163 = vrot.lane.b32.xlu1 %v2451_v1, %s2327_s25 }
  0x6b   :  { %169 = vrot.lane.b32.xlu0 %v2451_v1, %s2328_s26  ;;  %175 = vrot.lane.b32.xlu1 %v2451_v1, %s2329_s28 }
  0x6f   :  { %181 = vrot.lane.b32.xlu0 %v2451_v1, %s2330_s29  ;;  %187 = vrot.lane.b32.xlu1 %v2451_v1, %s2331_s9 }
  0xa9   :  { %v102_v2 = vpop.permute.xlu0 %101  ;;  %v114_v3 = vpop.permute.xlu1 %113 }
  0xaa   :  { %v192_v5 = vsel %vm191_vm0, %v2427_v0, %v102_v2 }
  0xad   :  { %v108_v6 = vpop.permute.xlu0 %107  ;;  %v120_v7 = vpop.permute.xlu1 %119 }
  0xae   :  { %v195_v8 = vsel %vm194_vm1, %v192_v5, %v108_v6 }
  0xaf   :  { %v198_v9 = vsel %vm197_vm2, %v195_v8, %v114_v3 }
  0xb0   :  { %v201_v10 = vsel %vm200_vm3, %v198_v9, %v120_v7 }
  0xb1   :  { %v126_v12 = vpop.permute.xlu0 %125  ;;  %v132_v13 = vpop.permute.xlu1 %131 }
  0xb2   :  { %v204_v14 = vsel %vm203_vm4, %v201_v10, %v126_v12 }
  0xb3   :  { %v207_v17 = vsel %vm206_vm5, %v204_v14, %v132_v13 }
  0xb5   :  { %v138_v18 = vpop.permute.xlu0 %137  ;;  %v144_v19 = vpop.permute.xlu1 %143 }
  0xb6   :  { %v210_v23 = vsel %vm209_vm6, %v207_v17, %v138_v18 }
  0xb7   :  { %v213_v26 = vsel %vm212_vm7, %v210_v23, %v144_v19 }
  0xb9   :  { %v150_v27 = vpop.permute.xlu0 %149  ;;  %v156_v28 = vpop.permute.xlu1 %155 }
  0xba   :  { %v216_v31 = vsel %vm3606_vm8, %v213_v26, %v150_v27 }
  0xbb   :  { %v2510_v32 = vsel %vm3605_vm9, %v216_v31, %v156_v28 }
  0xbc   :  { %v2516_v34 = vsub.f32 %v2510_v32, %v2496_v24  ;;  %v309_v35 = vsub.f32 %v2499_v25, %v2510_v32  ;;  %v357_v38 = vsub.f32 %v2503_v29, %v2510_v32  ;;  %v405_v39 = vsub.f32 %v2506_v30, %v2510_v32 }
  0xbd   :  { %v162_v36 = vpop.permute.xlu0 %161  ;;  %v168_v37 = vpop.permute.xlu1 %167  ;;  %vm245_vm15 = vcmp.ge.f32.partialorder %v2510_v32, %v2496_v24 }
  0xbe   :  { %v222_v40 = vsel %vm3602_vm10, %v2510_v32, %v162_v36  ;;  %vm257_vm10 = vcmp.lt.f32.partialorder %v2510_v32, %v2530_v42 }
  0xbf   :  { %v225_v43 = vsel %vm3604_vm11, %v222_v40, %v168_v37 }
  0xc1   :  { %v174_v44 = vpop.permute.xlu0 %173  ;;  %v180_v45 = vpop.permute.xlu1 %179 }
  0xc2   :  { %v228_v46 = vsel %vm3603_vm12, %v225_v43, %v174_v44  ;;  %vm261_vm12 = vmand %vm245_vm15, %vm257_vm10 }
  0xc3   :  { %v231_v52 = vsel %vm230_vm13, %v228_v46, %v180_v45  ;;  %v1750_v3 = vsel %vm261_vm12, 1.0, %v2332_v63 }
  0xc5   :  { %v186_v53 = vpop.permute.xlu0 %185  ;;  %v104_v54 = vpop.permute.xlu1 %103 }
  0xc6   :  { %v2553_v55 = vsel %vm233_vm14, %v231_v52, %v186_v53  ;;  %v193_v60 = vsel %vm191_vm0, %v2451_v1, %v104_v54 }
  0xc7   :  { %vm244_vm11 = vcmp.ge.f32.partialorder %v2553_v55, %v2535_v47  ;;  %vm256_vm9 = vcmp.lt.f32.partialorder %v2553_v55, %v251_v48  ;;  %v2560_v56 = vsub.f32 %v2553_v55, %v2535_v47  ;;  %v308_v57 = vsub.f32 %v2543_v49, %v2553_v55 }
  0xc8   :  { %vm260_vm8 = vmand %vm244_vm11, %vm256_vm9  ;;  %v356_v58 = vsub.f32 %v2546_v50, %v2553_v55  ;;  %v404_v59 = vsub.f32 %v2549_v51, %v2553_v55  ;;  %vm3635_vm9 = vcmask 850944  }
  0xc9   :  { %v110_v61 = vpop.permute.xlu0 %109  ;;  %v116_v62 = vpop.permute.xlu1 %115  ;;  %v1749_v2 = vsel %vm260_vm8, 1.0, %v2332_v63 }
  0xca   :  { %v196_v4 = vsel %vm194_vm1, %v193_v60, %v110_v61  ;;  %v2128_v5 = vpack.i.bf16 %v1750_v3, %v1749_v2  ;;  %vm3631_vm1 = vcmask 588800  }
  0xcb   :  { %v199_v6 = vsel %vm197_vm2, %v196_v4, %v116_v62  ;;  %vm3632_vm2 = vcmask 654336  }
  0xcc   :  { %2129 = vrot.lane.b32.xlu0 %v2128_v5, %s2331_s9 }
  0xcd   :  { %v122_v7 = vpop.permute.xlu0 %121  ;;  %v128_v8 = vpop.permute.xlu1 %127 }
  0xce   :  { %v202_v9 = vsel %vm200_vm3, %v199_v6, %v122_v7 }
  0xcf   :  { %v205_v10 = vsel %vm203_vm4, %v202_v9, %v128_v8  ;;  %vm3633_vm4 = vcmask 719872   ;;  %v297_v9 = vmul.f32 %v1750_v3, %v2516_v34 }
  0xd1   :  { %v134_v11 = vpop.permute.xlu0 %133  ;;  %v140_v12 = vpop.permute.xlu1 %139 }
  0xd2   :  { %v208_v13 = vsel %vm206_vm5, %v205_v10, %v134_v11  ;;  %vm3634_vm5 = vcmask 785408   ;;  %v296_v10 = vmul.f32 %v1749_v2, %v2560_v56 }
  0xd3   :  { %v211_v14 = vsel %vm209_vm6, %v208_v13, %v140_v12 }
  0xd5   :  { %v146_v17 = vpop.permute.xlu0 %145  ;;  %v152_v18 = vpop.permute.xlu1 %151 }
  0xd6   :  { %v214_v19 = vsel %vm212_vm7, %v211_v14, %v146_v17 }
  0xd7   :  { %v217_v20 = vsel %vm3631_vm1, %v214_v19, %v152_v18  ;;  %vm3637_vm1 = vmmov %vm3632_vm2 }
  0xd9   :  { %v158_v23 = vpop.permute.xlu0 %157  ;;  %v164_v26 = vpop.permute.xlu1 %163 }
  0xda   :  { %v2582_v27 = vsel %vm3632_vm2, %v217_v20, %v158_v23 }
  0xdb   :  { %v2586_v28 = vsub.f32 %v2582_v27, %v2496_v24  ;;  %v311_v31 = vsub.f32 %v2499_v25, %v2582_v27  ;;  %v359_v36 = vsub.f32 %v2503_v29, %v2582_v27  ;;  %v407_v37 = vsub.f32 %v2506_v30, %v2582_v27  ;;  %v74_v29 = vld [vmem:[#allocation2 + $0x20] sm:$0xff] }
  0xdc   :  { %v223_v40 = vsel %vm3633_vm4, %v2582_v27, %v164_v26  ;;  %vm247_vm6 = vcmp.ge.f32.partialorder %v2582_v27, %v2496_v24  ;;  %vm259_vm8 = vcmp.lt.f32.partialorder %v2582_v27, %v2530_v42  ;;  %vm3639_vm4 = vmmov %vm3637_vm1  ;;  %v420_v30 = vsub.f32 0.0, %v2427_v0 }
  0xdd   :  { %v170_v41 = vpop.permute.xlu0 %169  ;;  %v176_v43 = vpop.permute.xlu1 %175  ;;  %vm263_vm10 = vmand %vm247_vm6, %vm259_vm8 }
  0xde   :  { %v226_v44 = vsel %vm3634_vm5, %v223_v40, %v170_v41  ;;  %v1752_v4 = vsel %vm263_vm10, 1.0, %v2332_v63  ;;  %vm3640_vm5 = vmmov %vm3637_vm1  ;;  %v422_v27 = vmul.f32 1.442695, %v420_v30 }
  0xdf   :  { %v229_v45 = vsel %vm3635_vm9, %v226_v44, %v176_v43  ;;  %vm3641_vm6 = vmmov %vm3637_vm1 }
  0xe0   :  { %2203 = vpow2.f32 %v422_v27 }
  0xe1   :  { %v182_v46 = vpop.permute.xlu0 %181  ;;  %v188_v52 = vpop.permute.xlu1 %187 }
  0xe2   :  { %v232_v53 = vsel %vm230_vm13, %v229_v45, %v182_v46  ;;  %vm3636_vm13 = vmmov %vm3632_vm2 }
  0xe3   :  { %v2604_v54 = vsel %vm233_vm14, %v232_v53, %v188_v52  ;;  %vm3638_vm2 = vmmov %vm3637_vm1 }
  0xe4   :  { %vm246_vm11 = vcmp.ge.f32.partialorder %v2604_v54, %v2535_v47  ;;  %vm258_vm12 = vcmp.lt.f32.partialorder %v2604_v54, %v251_v48  ;;  %v2611_v24 = vsub.f32 %v2604_v54, %v2535_v47  ;;  %v310_v42 = vsub.f32 %v2543_v49, %v2604_v54 }
  0xe5   :  { %vm262_vm15 = vmand %vm246_vm11, %vm258_vm12  ;;  %v358_v60 = vsub.f32 %v2546_v50, %v2604_v54  ;;  %v406_v61 = vsub.f32 %v2549_v51, %v2604_v54 }
  0xe6   :  { %v1751_v62 = vsel %vm262_vm15, 1.0, %v2332_v63 }
  0xe7   :  { %v2133_v5 = vpack.i.bf16 %v1752_v4, %v1751_v62  ;;  %v298_v49 = vmul.f32 %v1751_v62, %v2611_v24 }
  0xe9   :  { %2134 = vrot.lane.b32.xlu1 %v2133_v5, %s2331_s9 }
  0xea   :  { %v2204_v51 = vpop.eup %2203 }
 0x13e   :  { %v2130_v48 = vpop.permute.xlu0 %2129 }
 0x13f   :  { %v2132_v47 = vunpack.i.h.bf16 %v2130_v48  ;;  %v2131_v6 = vunpack.i.l.bf16 %v2130_v48 }
 0x141   :  { %v294_v7 = vsel %vm3636_vm13, %v2132_v47, 0.0  ;;  %v288_v8 = vsel %vm233_vm14, %v2131_v6, %v2132_v47 }
 0x142   :  { %v313_v11 = vmul.f32 %v309_v35, %v294_v7  ;;  %v312_v12 = vmul.f32 %v308_v57, %v288_v8  ;;  %v299_v35 = vmul.f32 %v1752_v4, %v2586_v28 }
 0x144   :  { %v317_v13 = vadd.f32 %v313_v11, %v297_v9  ;;  %v316_v14 = vadd.f32 %v312_v12, %v296_v10  ;;  %v70_v11 = vld [vmem:[#allocation2] sm:$0xff]  ;;  %v71_v12 = vld [vmem:[#allocation2 + $0x8] sm:$0xff] }
 0x146   :  { %v321_v17 = vmul.f32 20.999998, %v317_v13  ;;  %v320_v18 = vmul.f32 20.999998, %v316_v14  ;;  %v72_v13 = vld [vmem:[#allocation2 + $0x10] sm:$0xff]  ;;  %v2333_v14 = vmov 0.0|0.0  }
 0x147   :  { %1936 = vmatprep.subr.bf16.mxu0 %v2333_v14 }
 0x148   :  { %330 = vrot.lane.b32.xlu1 %v321_v17, %s2331_s9  ;;  %328 = vrot.lane.b32.xlu0 %v320_v18, %s2331_s9  ;;  %v345_v53 = vmul.f32 %v321_v17, %v2516_v34  ;;  %v344_v62 = vmul.f32 %v320_v18, %v2560_v56  ;;  %v1937_v17 = vpack.c.bf16 %v71_v12, %v70_v11  ;;  %v73_v18 = vld [vmem:[#allocation2 + $0x18] sm:$0xff]  ;;  %v94_v12 = vld [vmem:[#allocation2 + $0xc0] sm:$0xff] }
 0x14a   :  { %1938 = vmatpush1.bf16.msra.mxu0 %v1937_v17 }
 0x14b   :  { %1939 = vmatprep.subr.bf16.mxu0 %v2333_v14 }
 0x15b   :  { %v2135_v19 = vpop.permute.xlu1 %2134 }
 0x15c   :  { %v2137_v3 = vunpack.i.h.bf16 %v2135_v19  ;;  %v2136_v20 = vunpack.i.l.bf16 %v2135_v19 }
 0x15e   :  { %v295_v2 = vsel %vm3637_vm1, %v2137_v3, 0.0  ;;  %v289_v25 = vsel %vm233_vm14, %v2136_v20, %v2137_v3  ;;  %v1940_v20 = vpack.c.bf16 %v73_v18, %v72_v13  ;;  %v95_v13 = vld [vmem:[#allocation2 + $0xc8] sm:$0xff]  ;;  %v96_v18 = vld [vmem:[#allocation2 + $0xd0] sm:$0xff] }
 0x15f   :  { %v315_v57 = vmul.f32 %v311_v31, %v295_v2  ;;  %v314_v23 = vmul.f32 %v310_v42, %v289_v25  ;;  %v1973_v17 = vpack.c.bf16 %v95_v13, %v94_v12 }
 0x160   :  { %1941 = vmatpush1.bf16.msra.mxu0 %v1940_v20 }
 0x161   :  { %v319_v26 = vadd.f32 %v315_v57, %v299_v35  ;;  %v318_v40 = vadd.f32 %v314_v23, %v298_v49  ;;  %1942 = vmatprep.subr.bf16.mxu0 %v2333_v14  ;;  %v76_v35 = vld [vmem:[#allocation2 + $0x30] sm:$0xff]  ;;  %v77_v49 = vld [vmem:[#allocation2 + $0x38] sm:$0xff]  ;;  %v78_v23 = vld [vmem:[#allocation2 + $0x40] sm:$0xff] }
 0x162   :  { %v1946_v57 = vpack.c.bf16 %v77_v49, %v76_v35 }
 0x163   :  { %v323_v41 = vmul.f32 20.999998, %v319_v26  ;;  %v322_v43 = vmul.f32 20.999998, %v318_v40  ;;  %v79_v26 = vld [vmem:[#allocation2 + $0x48] sm:$0xff] }
 0x164   :  { %v1949_v40 = vpack.c.bf16 %v79_v26, %v78_v23 }
 0x165   :  { %334 = vrot.lane.b32.xlu1 %v323_v41, %s2331_s9  ;;  %332 = vrot.lane.b32.xlu0 %v322_v43, %s2331_s9 }
 0x1ba   :  { %v331_v44 = vpop.permute.xlu1 %330  ;;  %v329_v45 = vpop.permute.xlu0 %328 }
 0x1bb   :  { %v342_v46 = vsel %vm3638_vm2, %v331_v44, 0.0  ;;  %v336_v52 = vsel %vm233_vm14, %v329_v45, %v331_v44  ;;  %v82_v45 = vld [vmem:[#allocation2 + $0x60] sm:$0xff] }
 0x1bc   :  { %v361_v31 = vmul.f32 %v357_v38, %v342_v46  ;;  %v360_v42 = vmul.f32 %v356_v58, %v336_v52  ;;  %v347_v38 = vmul.f32 %v323_v41, %v2586_v28  ;;  %v346_v58 = vmul.f32 %v322_v43, %v2611_v24  ;;  %v80_v41 = vld [vmem:[#allocation2 + $0x50] sm:$0xff]  ;;  %v81_v43 = vld [vmem:[#allocation2 + $0x58] sm:$0xff]  ;;  %v83_v46 = vld [vmem:[#allocation2 + $0x68] sm:$0xff] }
 0x1bd   :  { %v1952_v44 = vpack.c.bf16 %v81_v43, %v80_v41  ;;  %v1955_v52 = vpack.c.bf16 %v83_v46, %v82_v45 }
 0x1be   :  { %v365_v4 = vadd.f32 %v361_v31, %v345_v53  ;;  %v364_v5 = vadd.f32 %v360_v42, %v344_v62  ;;  %v84_v53 = vld [vmem:[#allocation2 + $0x70] sm:$0xff]  ;;  %v85_v62 = vld [vmem:[#allocation2 + $0x78] sm:$0xff]  ;;  %v86_v42 = vld [vmem:[#allocation2 + $0x80] sm:$0xff] }
 0x1bf   :  { %v1958_v31 = vpack.c.bf16 %v85_v62, %v84_v53 }
 0x1c0   :  { %v2650_v48 = vmul.f32 10.499999, %v365_v4  ;;  %v2652_v47 = vmul.f32 10.499999, %v364_v5  ;;  %v87_v4 = vld [vmem:[#allocation2 + $0x88] sm:$0xff] }
 0x1c1   :  { %v1961_v5 = vpack.c.bf16 %v87_v4, %v86_v42 }
 0x1c2   :  { %378 = vrot.lane.b32.xlu1 %v2650_v48, %s2331_s9  ;;  %376 = vrot.lane.b32.xlu0 %v2652_v47, %s2331_s9 }
 0x1d7   :  { %v335_v6 = vpop.permute.xlu1 %334  ;;  %v333_v7 = vpop.permute.xlu0 %332 }
 0x1d8   :  { %v343_v8 = vsel %vm3639_vm4, %v335_v6, 0.0  ;;  %v337_v50 = vsel %vm233_vm14, %v333_v7, %v335_v6  ;;  %v88_v6 = vld [vmem:[#allocation2 + $0x90] sm:$0xff]  ;;  %v89_v7 = vld [vmem:[#allocation2 + $0x98] sm:$0xff] }
 0x1d9   :  { %v363_v9 = vmul.f32 %v359_v36, %v343_v8  ;;  %v362_v10 = vmul.f32 %v358_v60, %v337_v50  ;;  %v75_v36 = vld [vmem:[#allocation2 + $0x28] sm:$0xff]  ;;  %v90_v8 = vld [vmem:[#allocation2 + $0xa0] sm:$0xff] }
 0x1da   :  { %v1943_v60 = vpack.c.bf16 %v75_v36, %v74_v29  ;;  %v91_v50 = vld [vmem:[#allocation2 + $0xa8] sm:$0xff] }
 0x1db   :  { %v367_v19 = vadd.f32 %v363_v9, %v347_v38  ;;  %v366_v3 = vadd.f32 %v362_v10, %v346_v58  ;;  %v1964_v38 = vpack.c.bf16 %v89_v7, %v88_v6  ;;  %v1967_v58 = vpack.c.bf16 %v91_v50, %v90_v8  ;;  %v92_v9 = vld [vmem:[#allocation2 + $0xb0] sm:$0xff]  ;;  %v93_v10 = vld [vmem:[#allocation2 + $0xb8] sm:$0xff] }
 0x1dc   :  { %1944 = vmatpush1.bf16.msra.mxu0 %v1943_v60  ;;  %v1970_v11 = vpack.c.bf16 %v93_v10, %v92_v9 }
 0x1dd   :  { %v2666_v2 = vmul.f32 10.499999, %v367_v19  ;;  %v2668_v25 = vmul.f32 10.499999, %v366_v3  ;;  %1945 = vmatprep.subr.bf16.mxu0 %v2333_v14  ;;  %v97_v19 = vld [vmem:[#allocation2 + $0xd8] sm:$0xff] }
 0x1de   :  { %v1976_v3 = vpack.c.bf16 %v97_v19, %v96_v18  ;;  %v2746_v18 = vld [vmem:[#allocation5] sm:$0x1f]  ;;  %v2748_v19 = vld [vmem:[#allocation5 + $0x8] sm:$0x1f] }
 0x1df   :  { %382 = vrot.lane.b32.xlu1 %v2666_v2, %s2331_s9  ;;  %380 = vrot.lane.b32.xlu0 %v2668_v25, %s2331_s9  ;;  %v2835_v27 = vrot.slane %v2746_v18, %v2484_v16 }
 0x1e0   :  { %1947 = vmatpush1.bf16.msra.mxu0 %v1946_v57  ;;  %v393_v57 = vmul.f32 %v2650_v48, %v2516_v34  ;;  %v394_v48 = vmul.f32 %v2668_v25, %v2611_v24 }
 0x1e1   :  { %1948 = vmatprep.subr.bf16.mxu0 %v2333_v14 }
 0x1e4   :  { %1950 = vmatpush1.bf16.msra.mxu0 %v1949_v40 }
 0x1e5   :  { %1951 = vmatprep.subr.bf16.mxu0 %v2333_v14 }
 0x1e8   :  { %1953 = vmatpush1.bf16.msra.mxu0 %v1952_v44 }
 0x1e9   :  { %1954 = vmatprep.subr.bf16.mxu0 %v2333_v14 }
 0x1ec   :  { %1956 = vmatpush1.bf16.msra.mxu0 %v1955_v52 }
 0x1ed   :  { %1957 = vmatprep.subr.bf16.mxu0 %v2333_v14 }
 0x1f0   :  { %1959 = vmatpush1.bf16.msra.mxu0 %v1958_v31 }
 0x1f1   :  { %1960 = vmatprep.subr.bf16.mxu0 %v2333_v14 }
 0x1f4   :  { %1962 = vmatpush1.bf16.msra.mxu0 %v1961_v5 }
 0x1f5   :  { %1963 = vmatprep.subr.bf16.mxu0 %v2333_v14 }
 0x1f8   :  { %1965 = vmatpush1.bf16.msra.mxu0 %v1964_v38  ;;  %v98_v38 = vld [vmem:[%s3597_s3] sm:$0x3] }
 0x1f9   :  { %1966 = vmatprep.subr.bf16.mxu0 %v2333_v14  ;;  %v534_v8 = vrot.slane %v98_v38, %v2482_v15  ;;  %v540_v50 = vrot.slane %v98_v38, %v2512_v33 }
 0x1fc   :  { %1968 = vmatpush1.bf16.msra.mxu0 %v1967_v58 }
 0x1fd   :  { %1969 = vmatprep.subr.bf16.mxu0 %v2333_v14 }
 0x200   :  { %1971 = vmatpush1.bf16.msra.mxu0 %v1970_v11 }
 0x201   :  { %1972 = vmatprep.subr.bf16.mxu0 %v2333_v14 }
 0x204   :  { %1974 = vmatpush1.bf16.msra.mxu0 %v1973_v17 }
 0x205   :  { %1975 = vmatprep.subr.bf16.mxu0 %v2333_v14  ;;  %v392_v14 = vmul.f32 %v2652_v47, %v2560_v56 }
 0x208   :  { %1977 = vmatpush1.bf16.msra.mxu0 %v1976_v3  ;;  %v2750_v3 = vld [vmem:[#allocation5 + $0x30] sm:$0x1f] }
 0x234   :  { %v379_v20 = vpop.permute.xlu1 %378  ;;  %v377_v29 = vpop.permute.xlu0 %376 }
 0x235   :  { %v390_v36 = vsel %vm3640_vm5, %v379_v20, 0.0  ;;  %v384_v60 = vsel %vm233_vm14, %v377_v29, %v379_v20  ;;  %v2752_v20 = vld [vmem:[#allocation5 + $0x10] sm:$0x1f]  ;;  %v2754_v29 = vld [vmem:[#allocation5 + $0x18] sm:$0x1f] }
 0x236   :  { %v409_v35 = vmul.f32 %v405_v39, %v390_v36  ;;  %v408_v49 = vmul.f32 %v404_v59, %v384_v60  ;;  %v395_v59 = vmul.f32 %v2666_v2, %v2586_v28  ;;  %v421_v28 = vsub.f32 0.0, %v2451_v1 }
 0x237   :  { %v2758_v36 = vrot.slane %v2746_v18, %v2482_v15  ;;  %v2762_v60 = vrot.slane %v2748_v19, %v2482_v15 }
 0x238   :  { %v413_v23 = vadd.f32 %v409_v35, %v393_v57  ;;  %v412_v26 = vadd.f32 %v408_v49, %v392_v14  ;;  %v424_v54 = vmul.f32 1.442695, %v421_v28  ;;  %v2764_v35 = vld [vmem:[#allocation5 + $0x20] sm:$0x1f]  ;;  %v2768_v49 = vrot.slane %v2746_v18, %v2512_v33  ;;  %v2774_v14 = vld [vmem:[#allocation5 + $0x28] sm:$0x1f] }
 0x239   :  { %v2772_v57 = vrot.slane %v2748_v19, %v2512_v33 }
 0x23a   :  { %v417_v40 = vmul.f32 6.9999995, %v413_v23  ;;  %v416_v41 = vmul.f32 6.9999995, %v412_v26  ;;  %v2778_v23 = vrot.slane %v2750_v3, %v2482_v15  ;;  %v2782_v26 = vrot.slane %v2750_v3, %v2484_v16 }
 0x23c   :  { %440 = vrot.lane.b32.xlu1 %v417_v40, %s2316_s23  ;;  %438 = vrot.lane.b32.xlu0 %v416_v41, %s2316_s23 }
 0x251   :  { %v383_v32 = vpop.permute.xlu1 %382  ;;  %v381_v39 = vpop.permute.xlu0 %380 }
 0x252   :  { %v391_v43 = vsel %vm3641_vm6, %v383_v32, 0.0  ;;  %v385_v55 = vsel %vm233_vm14, %v381_v39, %v383_v32  ;;  %vm3642_vm14 = vcmask 785408   ;;  %v2786_v32 = vrot.slane %v2752_v20, %v2482_v15 }
 0x253   :  { %v411_v34 = vmul.f32 %v407_v37, %v391_v43  ;;  %v410_v56 = vmul.f32 %v406_v61, %v385_v55  ;;  %v426_v37 = vadd.f32 1.0, %v2204_v51  ;;  %vm3643_vm8 = vmmov %vm3642_vm14  ;;  %v2790_v39 = vrot.slane %v2754_v29, %v2482_v15 }
 0x254   :  { %v2794_v43 = vrot.slane %v2750_v3, %v2490_v21  ;;  %v2798_v55 = vrot.slane %v2750_v3, %v2492_v22  ;;  %v2839_v51 = vrot.slane %v2748_v19, %v2484_v16 }
 0x255   :  { %v415_v47 = vadd.f32 %v411_v34, %v395_v59  ;;  %v414_v44 = vadd.f32 %v410_v56, %v394_v48  ;;  %2205 = vrcp.f32 %v426_v37  ;;  %v2804_v56 = vrot.slane %v2752_v20, %v2512_v33 }
 0x256   :  { %2207 = vpow2.f32 %v424_v54  ;;  %3646 = vst [vmem:[#allocation16_spill] sm:$0xff] %v2794_v43  ;;  %3647 = vst [vmem:[#allocation17_spill] sm:$0xff] %v2798_v55  ;;  %v2808_v59 = vrot.slane %v2754_v29, %v2512_v33  ;;  %v2812_v48 = vrot.slane %v2764_v35, %v2482_v15  ;;  %v2845_v54 = vrot.slane %v2752_v20, %v2484_v16 }
 0x257   :  { %v419_v45 = vmul.f32 6.9999995, %v415_v47  ;;  %v418_v46 = vmul.f32 6.9999995, %v414_v44  ;;  %v2819_v44 = vrot.slane %v2764_v35, %v2512_v33 }
 0x259   :  { %444 = vrot.lane.b32.xlu1 %v419_v45, %s2316_s23  ;;  %442 = vrot.lane.b32.xlu0 %v418_v46, %s2316_s23  ;;  %v2823_v45 = vrot.slane %v2774_v14, %v2482_v15  ;;  %v2827_v46 = vrot.slane %v2754_v29, %v2484_v16 }
 0x25f   :  { %v2206_v61 = vpop.eup %2205 }
 0x260   :  { %v432_v24 = vmul.f32 %v2206_v61, %v2427_v0  ;;  %v2208_v62 = vpop.eup %2207  ;;  %v2849_v61 = vrot.slane %v2764_v35, %v2484_v16 }
 0x261   :  { %v427_v31 = vadd.f32 1.0, %v2208_v62  ;;  %v2869_v62 = vrot.slane %v2748_v19, %v2490_v21 }
 0x263   :  { %2209 = vrcp.f32 %v427_v31 }
 0x26d   :  { %v2210_v42 = vpop.eup %2209 }
 0x26e   :  { %v433_v4 = vmul.f32 %v2210_v42, %v2451_v1 }
 0x2ae   :  { %v441_v2 = vpop.permute.xlu1 %440  ;;  %v439_v25 = vpop.permute.xlu0 %438 }
 0x2af   :  { %v446_v52 = vsel %vm191_vm0, %v439_v25, %v441_v2  ;;  %v450_v53 = vsel %vm191_vm0, %v432_v24, %v439_v25 }
 0x2b0   :  { %1753 = vmatprep.mubr.msk.f32.mxu0 %vm3642_vm14, %v446_v52  ;;  %v2861_v52 = vrot.slane %v2774_v14, %v2484_v16 }
 0x2b1   :  { %521 = vmatmul.mubr.f32.vlgmr.msra.gmra.mrb[0].mxu0 %v450_v53  ;;  %v2865_v53 = vrot.slane %v2746_v18, %v2490_v21 }
 0x2cb   :  { %v445_v5 = vpop.permute.xlu1 %444  ;;  %v443_v6 = vpop.permute.xlu0 %442 }
 0x2cc   :  { %v447_v7 = vsel %vm191_vm0, %v443_v6, %v445_v5  ;;  %v451_v0 = vsel %vm191_vm0, %v433_v4, %v443_v6  ;;  %vm3648_vm0 = vmmov %vm3643_vm8 }
 0x2cd   :  { %1754 = vmatprep.mubr.msk.f32.mxu0 %vm3643_vm8, %v447_v7  ;;  %v2913_v7 = vrot.slane %v2752_v20, %v2490_v21 }
 0x2ce   :  { %526 = vmatmul.mubr.f32.gmra.mrb[2].mxu0 %v451_v0 }
 0x384   :  { %v522_v58 = vpop.f32.mrb[0].mxu0 }
 0x385   :  { %v535_v9 = vmul.f32 %v534_v8, %v522_v58  ;;  %v524_v1 = vpop.f32.mrb[1].mxu0 }
 0x386   :  { %v2939_v1 = vrot.slane %v2774_v14, %v2490_v21 }
 0x387   :  { %v2730_v10 = vadd.f32 %v540_v50, %v535_v9  ;;  %v2935_v9 = vrot.slane %v2764_v35, %v2490_v21 }
 0x389   :  { %3644 = vst [vmem:[#allocation14_spill] sm:$0xff] %v2730_v10  ;;  %671 = vrot.lane.b32.xlu1 %v2730_v10, %s2324_s21  ;;  %665 = vrot.lane.b32.xlu0 %v2730_v10, %s2320_s5 }
 0x38d   :  { %677 = vrot.lane.b32.xlu0 %v2730_v10, %s2328_s26 }
 0x3a1   :  { %v527_v11 = vpop.f32.mrb[2].mxu0 }
 0x3a2   :  { %v536_v12 = vmul.f32 %v534_v8, %v527_v11  ;;  %v529_v13 = vpop.f32.mrb[3].mxu0  ;;  %v2924_v8 = vrot.slane %v2754_v29, %v2490_v21 }
 0x3a3   :  { %v2950_v13 = vrot.slane %v2748_v19, %v2492_v22 }
 0x3a4   :  { %v2738_v17 = vadd.f32 %v540_v50, %v536_v12  ;;  %v2946_v12 = vrot.slane %v2746_v18, %v2492_v22  ;;  %v2968_v18 = vrot.slane %v2764_v35, %v2492_v22 }
 0x3a5   :  { %3650 = vst [vmem:[#allocation19_spill] sm:$0xff] %v2950_v13 }
 0x3a6   :  { %3645 = vst [vmem:[#allocation15_spill] sm:$0xff] %v2738_v17  ;;  %673 = vrot.lane.b32.xlu0 %v2738_v17, %s2324_s21  ;;  %667 = vrot.lane.b32.xlu1 %v2738_v17, %s2320_s5  ;;  %3649 = vst [vmem:[#allocation18_spill] sm:$0xff] %v2946_v12 }
 0x3a7   :  { %3653 = vst [vmem:[#allocation22_spill] sm:$0xff] %v2968_v18 }
 0x3aa   :  { %679 = vrot.lane.b32.xlu1 %v2738_v17, %s2328_s26 }
 0x3fb   :  { %v672_v40 = vpop.permute.xlu1 %671  ;;  %v666_v41 = vpop.permute.xlu0 %665 }
 0x3fc   :  { %v683_v34 = vsel %vm200_vm3, %v2730_v10, %v666_v41 }
 0x3fd   :  { %v2815_v47 = vsel %vm212_vm7, %v683_v34, %v672_v40  ;;  %v2954_v40 = vrot.slane %v2752_v20, %v2492_v22  ;;  %v2964_v34 = vrot.slane %v2754_v29, %v2492_v22 }
 0x3fe   :  { %v2831_v30 = vsub.f32 %v2815_v47, %v2778_v23 }
 0x3ff   :  { %v678_v28 = vpop.permute.xlu0 %677  ;;  %3651 = vst [vmem:[#allocation20_spill] sm:$0xff] %v2954_v40  ;;  %3652 = vst [vmem:[#allocation21_spill] sm:$0xff] %v2964_v34 }
 0x400   :  { %v2857_v25 = vsel %vm3648_vm0, %v2815_v47, %v678_v28  ;;  %v754_v28 = vrot.slane %v2774_v14, %v2512_v33 }
 0x401   :  { %vm717_vm9 = vcmp.ge.f32.partialorder %v2857_v25, %v2758_v36  ;;  %vm718_vm10 = vcmp.ge.f32.partialorder %v2857_v25, %v2762_v60  ;;  %vm759_vm11 = vcmp.lt.f32.partialorder %v2857_v25, %v2768_v49  ;;  %vm760_vm12 = vcmp.lt.f32.partialorder %v2857_v25, %v2772_v57 }
 0x402   :  { %vm773_vm15 = vmand %vm717_vm9, %vm759_vm11  ;;  %v2881_v16 = vsub.f32 %v2857_v25, %v2758_v36  ;;  %v2885_v31 = vsub.f32 %v2857_v25, %v2762_v60  ;;  %vm719_vm13 = vcmp.ge.f32.partialorder %v2857_v25, %v2786_v32  ;;  %vm720_vm1 = vcmp.ge.f32.partialorder %v2857_v25, %v2790_v39 }
 0x403   :  { %vm774_vm2 = vmand %vm718_vm10, %vm760_vm12  ;;  %v2892_v42 = vsel %vm773_vm15, 1.0, %v2332_v63  ;;  %vm761_vm4 = vcmp.lt.f32.partialorder %v2857_v25, %v2804_v56  ;;  %vm762_vm5 = vcmp.lt.f32.partialorder %v2857_v25, %v2808_v59  ;;  %v2900_v4 = vsub.f32 %v2857_v25, %v2786_v32 }
 0x404   :  { %v2903_v5 = vsel %vm774_vm2, 1.0, %v2332_v63  ;;  %vm775_vm6 = vmand %vm719_vm13, %vm761_vm4  ;;  %v2907_v6 = vsub.f32 %v2857_v25, %v2790_v39  ;;  %vm721_vm14 = vcmp.ge.f32.partialorder %v2857_v25, %v2812_v48  ;;  %vm763_vm0 = vcmp.lt.f32.partialorder %v2857_v25, %v2819_v44 }
 0x405   :  { %v2138_v0 = vpack.i.bf16 %v2903_v5, %v2892_v42  ;;  %vm776_vm8 = vmand %vm720_vm1, %vm762_vm5  ;;  %v2918_v38 = vsel %vm775_vm6, 1.0, %v2332_v63  ;;  %v2931_v58 = vsub.f32 %v2857_v25, %v2812_v48  ;;  %v2958_v21 = vsub.f32 %v2857_v25, %v2823_v45 }
 0x406   :  { %v2927_v50 = vsel %vm776_vm8, 1.0, %v2332_v63  ;;  %vm777_vm9 = vmand %vm721_vm14, %vm763_vm0  ;;  %vm723_vm10 = vcmp.ge.f32.partialorder %v2815_v47, %v2778_v23  ;;  %vm722_vm12 = vcmp.ge.f32.partialorder %v2857_v25, %v2823_v45  ;;  %vm764_vm15 = vcmp.lt.f32.partialorder %v2857_v25, %v754_v28 }
 0x407   :  { %2139 = vrot.lane.b32.xlu0 %v2138_v0, %s2328_s26  ;;  %v2143_v11 = vpack.i.bf16 %v2927_v50, %v2918_v38  ;;  %v2979_v0 = vrot.slane %v2774_v14, %v2492_v22  ;;  %v2982_v29 = vsel %vm777_vm9, 1.0, %v2332_v63  ;;  %vm3655_vm13 = vcmask 785408   ;;  %vm3058_vm14 = vmand %vm722_vm12, %vm764_vm15 }
 0x409   :  { %2144 = vrot.lane.b32.xlu1 %v2143_v11, %s2328_s26  ;;  %3654 = vst [vmem:[#allocation23_spill] sm:$0xff] %v2979_v0  ;;  %v3016_v11 = vrot.slane %v2750_v3, %v2512_v33 }
 0x40b   :  { %851 = vrot.lane.b32.xlu0 %v2982_v29, %s2328_s26  ;;  %vm765_vm11 = vcmp.lt.f32.partialorder %v2815_v47, %v3016_v11 }
 0x40c   :  { %vm3046_vm1 = vmand %vm723_vm10, %vm765_vm11 }
 0x40d   :  { %v3121_v41 = vsel %vm3046_vm1, 1.0, %v2332_v63 }
 0x418   :  { %v674_v2 = vpop.permute.xlu0 %673  ;;  %v668_v20 = vpop.permute.xlu1 %667 }
 0x419   :  { %v684_v24 = vsel %vm200_vm3, %v2738_v17, %v668_v20  ;;  %v900_v20 = vmul.f32 %v2903_v5, %v2885_v31 }
 0x41a   :  { %v3023_v22 = vsel %vm212_vm7, %v684_v24, %v674_v2 }
 0x41b   :  { %v3034_v3 = vsub.f32 %v3023_v22, %v2778_v23 }
 0x41c   :  { %v680_v24 = vpop.permute.xlu1 %679 }
 0x41d   :  { %v3044_v35 = vsel %vm3655_vm13, %v3023_v22, %v680_v24 }
 0x41e   :  { %vm726_vm2 = vcmp.ge.f32.partialorder %v3044_v35, %v2786_v32  ;;  %vm727_vm4 = vcmp.ge.f32.partialorder %v3044_v35, %v2790_v39  ;;  %vm768_vm5 = vcmp.lt.f32.partialorder %v3044_v35, %v2804_v56  ;;  %vm769_vm6 = vcmp.lt.f32.partialorder %v3044_v35, %v2808_v59 }
 0x41f   :  { %vm782_vm8 = vmand %vm726_vm2, %vm768_vm5  ;;  %v3064_v24 = vsub.f32 %v3044_v35, %v2786_v32  ;;  %v3068_v2 = vsub.f32 %v3044_v35, %v2790_v39  ;;  %vm724_vm0 = vcmp.ge.f32.partialorder %v3044_v35, %v2758_v36  ;;  %vm725_vm9 = vcmp.ge.f32.partialorder %v3044_v35, %v2762_v60 }
 0x420   :  { %vm783_vm10 = vmand %vm727_vm4, %vm769_vm6  ;;  %v3075_v56 = vsel %vm782_vm8, 1.0, %v2332_v63  ;;  %vm766_vm11 = vcmp.lt.f32.partialorder %v3044_v35, %v2768_v49  ;;  %vm767_vm12 = vcmp.lt.f32.partialorder %v3044_v35, %v2772_v57  ;;  %v3083_v32 = vsub.f32 %v3044_v35, %v2758_v36 }
 0x421   :  { %v3086_v39 = vsel %vm783_vm10, 1.0, %v2332_v63  ;;  %vm780_vm15 = vmand %vm724_vm0, %vm766_vm11  ;;  %v3090_v59 = vsub.f32 %v3044_v35, %v2762_v60  ;;  %vm728_vm13 = vcmp.ge.f32.partialorder %v3044_v35, %v2812_v48  ;;  %vm770_vm4 = vcmp.lt.f32.partialorder %v3044_v35, %v2819_v44 }
 0x422   :  { %v2153_v49 = vpack.i.bf16 %v3086_v39, %v3075_v56  ;;  %vm781_vm2 = vmand %vm725_vm9, %vm767_vm12  ;;  %v3097_v57 = vsel %vm780_vm15, 1.0, %v2332_v63  ;;  %v3107_v60 = vsel %vm3058_vm14, 1.0, %v2332_v63  ;;  %v3111_v14 = vsub.f32 %v3044_v35, %v2812_v48 }
 0x423   :  { %v3102_v36 = vsel %vm781_vm2, 1.0, %v2332_v63  ;;  %vm729_vm5 = vcmp.ge.f32.partialorder %v3044_v35, %v2823_v45  ;;  %vm784_vm6 = vmand %vm728_vm13, %vm770_vm4  ;;  %vm771_vm14 = vcmp.lt.f32.partialorder %v3044_v35, %v754_v28  ;;  %vm730_vm8 = vcmp.ge.f32.partialorder %v3023_v22, %v2778_v23 }
 0x424   :  { %2154 = vrot.lane.b32.xlu0 %v2153_v49, %s2328_s26  ;;  %v2148_v44 = vpack.i.bf16 %v3102_v36, %v3097_v57  ;;  %vm772_vm0 = vcmp.lt.f32.partialorder %v3023_v22, %v3016_v11  ;;  %vm785_vm9 = vmand %vm729_vm5, %vm771_vm14  ;;  %v3130_v48 = vsub.f32 %v3044_v35, %v2823_v45  ;;  %v2158_v37 = vpack.i.bf16 %v3121_v41, %v3107_v60 }
 0x425   :  { %v3144_v45 = vsel %vm784_vm6, 1.0, %v2332_v63  ;;  %v3147_v19 = vsel %vm785_vm9, 1.0, %v2332_v63  ;;  %vm786_vm1 = vmand %vm730_vm8, %vm772_vm0  ;;  %vm3660_vm10 = vcmask 785408  }
 0x426   :  { %2149 = vrot.lane.b32.xlu1 %v2148_v44, %s2328_s26  ;;  %v3184_v23 = vsel %vm786_vm1, 1.0, %v2332_v63  ;;  %v899_v63 = vmul.f32 %v2892_v42, %v2881_v16  ;;  %vm3662_vm11 = vmmov %vm3660_vm10  ;;  %v3665_v42 = vsub.f32 %v2827_v46, %v2857_v25 }
 0x427   :  { %v2163_v49 = vpack.i.bf16 %v3184_v23, %v3147_v19  ;;  %vm3663_vm12 = vmmov %vm3660_vm10 }
 0x428   :  { %2159 = vrot.lane.b32.xlu0 %v2158_v37, %s2328_s26  ;;  %v901_v37 = vmul.f32 %v2918_v38, %v2900_v4  ;;  %vm3664_vm15 = vmmov %vm3660_vm10  ;;  %v3666_v38 = vsub.f32 %v2839_v51, %v2857_v25 }
 0x429   :  { %vm3668_vm13 = vmmov %vm3660_vm10 }
 0x42a   :  { %865 = vrot.lane.b32.xlu1 %v3144_v45, %s2328_s26  ;;  %vm3670_vm2 = vmmov %vm3660_vm10 }
 0x42b   :  { %vm3671_vm4 = vmmov %vm3670_vm2 }
 0x42c   :  { %vm3674_vm5 = vmmov %vm3670_vm2 }
 0x42d   :  { %vm3675_vm6 = vmmov %vm3670_vm2 }
 0x42e   :  { %2164 = vrot.lane.b32.xlu1 %v2163_v49, %s2328_s26  ;;  %v3661_v49 = vsub.f32 %v2835_v27, %v2857_v25  ;;  %vm3676_vm14 = vmmov %vm3670_vm2 }
 0x42f   :  { %vm3681_vm8 = vmmov %vm3670_vm2 }
 0x430   :  { %vm3682_vm0 = vmmov %vm3670_vm2 }
 0x431   :  { %vm3686_vm9 = vmmov %vm3682_vm0 }
 0x432   :  { %vm3688_vm1 = vmmov %vm3682_vm0 }
 0x479   :  { %v2140_v28 = vpop.permute.xlu0 %2139 }
 0x47a   :  { %v2142_v33 = vunpack.i.h.bf16 %v2140_v28  ;;  %v2141_v11 = vunpack.i.l.bf16 %v2140_v28  ;;  %v902_v28 = vmul.f32 %v2927_v50, %v2907_v6 }
 0x47b   :  { %v2145_v15 = vpop.permute.xlu1 %2144 }
 0x47c   :  { %v871_v44 = vsel %vm3660_vm10, %v2141_v11, %v2142_v33  ;;  %v2147_v17 = vunpack.i.h.bf16 %v2145_v15  ;;  %v2146_v10 = vunpack.i.l.bf16 %v2145_v15  ;;  %vm3690_vm10 = vmmov %vm3682_vm0 }
 0x47d   :  { %v852_v55 = vpop.permute.xlu0 %851  ;;  %v955_v0 = vmul.f32 %v3661_v49, %v871_v44  ;;  %v3667_v44 = vsub.f32 %v2845_v54, %v2857_v25 }
 0x47e   :  { %v872_v11 = vsel %vm3662_vm11, %v2142_v33, %v2146_v10  ;;  %v873_v15 = vsel %vm3663_vm12, %v2146_v10, %v2147_v17  ;;  %v874_v5 = vsel %vm3664_vm15, %v2147_v17, %v852_v55  ;;  %vm3692_vm11 = vmmov %vm3682_vm0 }
 0x47f   :  { %v958_v18 = vmul.f32 %v3665_v42, %v874_v5  ;;  %v969_v34 = vadd.f32 %v955_v0, %v899_v63  ;;  %v956_v40 = vmul.f32 %v3666_v38, %v872_v11  ;;  %v957_v49 = vmul.f32 %v3667_v44, %v873_v15  ;;  %vm3694_vm12 = vmmov %vm3682_vm0 }
 0x480   :  { %v909_v15 = vmul.f32 %v3086_v39, %v3068_v2  ;;  %v908_v5 = vmul.f32 %v3075_v56, %v3064_v24  ;;  %v906_v42 = vmul.f32 %v3097_v57, %v3083_v32  ;;  %v3669_v44 = vsub.f32 %v2845_v54, %v3044_v35  ;;  %vm3695_vm15 = vmmov %vm3682_vm0 }
 0x481   :  { %v3213_v50 = vmul.f32 20.999998, %v969_v34  ;;  %v970_v33 = vadd.f32 %v956_v40, %v900_v20  ;;  %v971_v13 = vadd.f32 %v957_v49, %v901_v37  ;;  %v972_v10 = vadd.f32 %v958_v18, %v902_v28 }
 0x482   :  { %v905_v37 = vmul.f32 %v3121_v41, %v2831_v30  ;;  %v907_v39 = vmul.f32 %v3102_v36, %v3090_v59  ;;  %v3672_v56 = vsub.f32 %v2835_v27, %v3044_v35  ;;  %v3673_v57 = vsub.f32 %v2839_v51, %v3044_v35 }
 0x483   :  { %1011 = vrot.lane.b32.xlu0 %v3213_v50, %s2328_s26  ;;  %v3217_v17 = vmul.f32 20.999998, %v970_v33  ;;  %v3221_v0 = vmul.f32 20.999998, %v971_v13  ;;  %v3225_v63 = vmul.f32 20.999998, %v972_v10  ;;  %v3677_v36 = vsub.f32 %v2782_v26, %v2815_v47 }
 0x484   :  { %v3678_v27 = vsub.f32 %v2827_v46, %v3044_v35 }
 0x485   :  { %1013 = vrot.lane.b32.xlu1 %v3217_v17, %s2328_s26 }
 0x487   :  { %1015 = vrot.lane.b32.xlu0 %v3221_v0, %s2328_s26 }
 0x489   :  { %1017 = vrot.lane.b32.xlu1 %v3225_v63, %s2328_s26 }
 0x496   :  { %v2155_v40 = vpop.permute.xlu0 %2154 }
 0x497   :  { %v2157_v34 = vunpack.i.h.bf16 %v2155_v40  ;;  %v2156_v18 = vunpack.i.l.bf16 %v2155_v40 }
 0x498   :  { %v2150_v20 = vpop.permute.xlu1 %2149 }
 0x499   :  { %v879_v28 = vsel %vm3668_vm13, %v2156_v18, %v2157_v34  ;;  %v2152_v11 = vunpack.i.h.bf16 %v2150_v20  ;;  %v2151_v13 = vunpack.i.l.bf16 %v2150_v20  ;;  %vm3698_vm13 = vmmov %vm3682_vm0 }
 0x49a   :  { %v2160_v38 = vpop.permute.xlu0 %2159  ;;  %v964_v49 = vmul.f32 %v3669_v44, %v879_v28 }
 0x49b   :  { %v878_v41 = vsel %vm3670_vm2, %v2152_v11, %v2156_v18  ;;  %v877_v33 = vsel %vm3671_vm4, %v2151_v13, %v2152_v11  ;;  %v2162_v10 = vunpack.i.h.bf16 %v2160_v38  ;;  %v2161_v40 = vunpack.i.l.bf16 %v2160_v38  ;;  %vm3699_vm2 = vmmov %vm3682_vm0 }
 0x49c   :  { %v866_v20 = vpop.permute.xlu1 %865  ;;  %v962_v12 = vmul.f32 %v3672_v56, %v877_v33  ;;  %v963_v43 = vmul.f32 %v3673_v57, %v878_v41  ;;  %v978_v54 = vadd.f32 %v964_v49, %v908_v5  ;;  %v903_v5 = vmul.f32 %v2982_v29, %v2931_v58  ;;  %vm3702_vm4 = vmmov %vm3682_vm0 }
 0x49d   :  { %v897_v28 = vsel %vm212_vm7, %v2162_v10, 0.0  ;;  %v875_v18 = vsel %vm3674_vm5, %v852_v55, %v2161_v40  ;;  %v876_v11 = vsel %vm3675_vm6, %v2161_v40, %v2162_v10  ;;  %v880_v13 = vsel %vm3676_vm14, %v2157_v34, %v866_v20  ;;  %vm3703_vm5 = vmmov %vm3682_vm0 }
 0x49e   :  { %v961_v38 = vmul.f32 %v3677_v36, %v897_v28  ;;  %v965_v44 = vmul.f32 %v3678_v27, %v880_v13  ;;  %v976_v33 = vadd.f32 %v962_v12, %v906_v42  ;;  %v977_v51 = vadd.f32 %v963_v43, %v907_v39  ;;  %vm3708_vm6 = vmmov %vm3682_vm0 }
 0x49f   :  { %v904_v55 = vmul.f32 %v3107_v60, %v2958_v21  ;;  %v3679_v49 = vsub.f32 %v2849_v61, %v2857_v25  ;;  %v3680_v41 = vsub.f32 %v2861_v52, %v2857_v25  ;;  %v992_v13 = vmul.f32 20.999998, %v978_v54  ;;  %vm3709_vm14 = vmmov %vm3682_vm0 }
 0x4a0   :  { %v2165_v40 = vpop.permute.xlu1 %2164  ;;  %v3271_v56 = vmul.f32 20.999998, %v976_v33  ;;  %v3273_v46 = vmul.f32 20.999998, %v977_v51  ;;  %v979_v43 = vadd.f32 %v965_v44, %v909_v15  ;;  %v975_v12 = vadd.f32 %v961_v38, %v905_v37 }
 0x4a1   :  { %v959_v34 = vmul.f32 %v3679_v49, %v875_v18  ;;  %v960_v10 = vmul.f32 %v3680_v41, %v876_v11  ;;  %v2167_v42 = vunpack.i.h.bf16 %v2165_v40  ;;  %v2166_v29 = vunpack.i.l.bf16 %v2165_v40 }
 0x4a2   :  { %1025 = vrot.lane.b32.xlu0 %v3271_v56, %s2328_s26  ;;  %1027 = vrot.lane.b32.xlu1 %v3273_v46, %s2328_s26  ;;  %v912_v15 = vmul.f32 %v3184_v23, %v3034_v3  ;;  %v3683_v37 = vsub.f32 %v2782_v26, %v3023_v22  ;;  %v3287_v36 = vmul.f32 20.999998, %v979_v43  ;;  %v910_v38 = vmul.f32 %v3144_v45, %v3111_v14 }
 0x4a3   :  { %v973_v39 = vadd.f32 %v959_v34, %v903_v5  ;;  %v974_v60 = vadd.f32 %v960_v10, %v904_v55  ;;  %v898_v57 = vsel %vm212_vm7, %v2167_v42, 0.0  ;;  %v881_v28 = vsel %vm3681_vm8, %v866_v20, %v2166_v29  ;;  %vm3713_vm8 = vmmov %vm3682_vm0 }
 0x4a4   :  { %v882_v18 = vsel %vm3682_vm0, %v2166_v29, %v2167_v42  ;;  %v968_v11 = vmul.f32 %v3683_v37, %v898_v57  ;;  %v911_v27 = vmul.f32 %v3147_v19, %v3130_v48  ;;  %v3684_v20 = vsub.f32 %v2849_v61, %v3044_v35 }
 0x4a5   :  { %v3685_v23 = vsub.f32 %v2861_v52, %v3044_v35  ;;  %v987_v45 = vmul.f32 20.999998, %v973_v39  ;;  %v988_v5 = vmul.f32 20.999998, %v974_v60  ;;  %v989_v61 = vmul.f32 20.999998, %v975_v12 }
 0x4a6   :  { %v966_v44 = vmul.f32 %v3684_v20, %v881_v28  ;;  %1029 = vrot.lane.b32.xlu0 %v992_v13, %s2328_s26  ;;  %1031 = vrot.lane.b32.xlu1 %v3287_v36, %s2328_s26  ;;  %v982_v26 = vadd.f32 %v968_v11, %v912_v15  ;;  %v1067_v10 = vmul.f32 %v3213_v50, %v2881_v16 }
 0x4a7   :  { %v967_v33 = vmul.f32 %v3685_v23, %v882_v18  ;;  %v3687_v40 = vsub.f32 %v2865_v53, %v2857_v25  ;;  %v1068_v29 = vmul.f32 %v3217_v17, %v2885_v31  ;;  %v3689_v39 = vsub.f32 %v2869_v62, %v2857_v25 }
 0x4a8   :  { %v980_v54 = vadd.f32 %v966_v44, %v910_v38  ;;  %v3311_v55 = vmul.f32 20.999998, %v982_v26  ;;  %v1069_v50 = vmul.f32 %v3221_v0, %v2900_v4  ;;  %v3691_v15 = vsub.f32 %v2913_v7, %v2857_v25 }
 0x4a9   :  { %v981_v51 = vadd.f32 %v967_v33, %v911_v27  ;;  %v1074_v33 = vmul.f32 %v3271_v56, %v3083_v32  ;;  %v3693_v26 = vsub.f32 %v2865_v53, %v3044_v35  ;;  %v3697_v53 = vsub.f32 %v2913_v7, %v3044_v35 }
 0x4aa   :  { %1019 = vrot.lane.b32.xlu0 %v987_v45, %s2328_s26  ;;  %1021 = vrot.lane.b32.xlu1 %v988_v5, %s2328_s26  ;;  %v3304_v19 = vmul.f32 20.999998, %v980_v54  ;;  %v3700_v7 = vsub.f32 %v2924_v8, %v2857_v25 }
 0x4ab   :  { %v3309_v52 = vmul.f32 20.999998, %v981_v51 }
 0x4ae   :  { %1023 = vrot.lane.b32.xlu0 %v989_v61, %s2328_s26  ;;  %1033 = vrot.lane.b32.xlu1 %v3304_v19, %s2328_s26 }
 0x4b2   :  { %1035 = vrot.lane.b32.xlu0 %v3309_v52, %s2328_s26  ;;  %1037 = vrot.lane.b32.xlu1 %v3311_v55, %s2328_s26 }
 0x4f5   :  { %v1012_v49 = vpop.permute.xlu0 %1011 }
 0x4f7   :  { %v1014_v34 = vpop.permute.xlu1 %1013 }
 0x4f8   :  { %v1039_v41 = vsel %vm3686_vm9, %v1012_v49, %v1014_v34  ;;  %vm3718_vm9 = vmmov %vm3682_vm0 }
 0x4f9   :  { %v1123_v43 = vmul.f32 %v3687_v40, %v1039_v41  ;;  %v1016_v12 = vpop.permute.xlu0 %1015  ;;  %v1076_v41 = vmul.f32 %v992_v13, %v3064_v24 }
 0x4fa   :  { %v1040_v42 = vsel %vm3688_vm1, %v1014_v34, %v1016_v12  ;;  %vm3719_vm1 = vmmov %vm3682_vm0 }
 0x4fb   :  { %v1124_v60 = vmul.f32 %v3689_v39, %v1040_v42  ;;  %v1018_v57 = vpop.permute.xlu1 %1017  ;;  %v1137_v28 = vadd.f32 %v1123_v43, %v1067_v10  ;;  %v1075_v43 = vmul.f32 %v3273_v46, %v3090_v59  ;;  %v1070_v46 = vmul.f32 %v3225_v63, %v2907_v6 }
 0x4fc   :  { %v1041_v18 = vsel %vm3690_vm10, %v1016_v12, %v1018_v57  ;;  %v3696_v12 = vsub.f32 %v2869_v62, %v3044_v35  ;;  %v1071_v63 = vmul.f32 %v987_v45, %v2931_v58  ;;  %vm3722_vm10 = vmmov %vm3682_vm0 }
 0x4fd   :  { %v1125_v37 = vmul.f32 %v3691_v15, %v1041_v18  ;;  %v3335_v11 = vmul.f32 10.499999, %v1137_v28  ;;  %v1138_v38 = vadd.f32 %v1124_v60, %v1068_v29  ;;  %v3701_v15 = vsub.f32 %v2935_v9, %v2857_v25 }
 0x4ff   :  { %1179 = vrot.lane.b32.xlu0 %v3335_v11, %s2328_s26  ;;  %v1139_v17 = vadd.f32 %v1125_v37, %v1069_v50  ;;  %v3339_v27 = vmul.f32 10.499999, %v1138_v38 }
 0x501   :  { %v3341_v20 = vmul.f32 10.499999, %v1139_v17  ;;  %1181 = vrot.lane.b32.xlu1 %v3339_v27, %s2328_s26 }
 0x503   :  { %1183 = vrot.lane.b32.xlu0 %v3341_v20, %s2328_s26 }
 0x514   :  { %v1026_v0 = vpop.permute.xlu0 %1025  ;;  %v1028_v44 = vpop.permute.xlu1 %1027 }
 0x515   :  { %v1045_v23 = vsel %vm3692_vm11, %v1026_v0, %v1028_v44  ;;  %v1077_v0 = vmul.f32 %v3287_v36, %v3068_v2  ;;  %vm3725_vm11 = vmmov %vm3682_vm0 }
 0x516   :  { %v1130_v54 = vmul.f32 %v3693_v26, %v1045_v23 }
 0x518   :  { %v1030_v51 = vpop.permute.xlu0 %1029  ;;  %v1032_v49 = vpop.permute.xlu1 %1031  ;;  %v1144_v34 = vadd.f32 %v1130_v54, %v1074_v33 }
 0x519   :  { %v1046_v10 = vsel %vm3694_vm12, %v1028_v44, %v1030_v51  ;;  %v1047_v40 = vsel %vm3695_vm15, %v1030_v51, %v1032_v49  ;;  %v1073_v44 = vmul.f32 %v989_v61, %v2831_v30  ;;  %vm3728_vm12 = vmmov %vm3682_vm0 }
 0x51a   :  { %v1131_v56 = vmul.f32 %v3696_v12, %v1046_v10  ;;  %v1132_v42 = vmul.f32 %v3697_v53, %v1047_v40  ;;  %v3364_v29 = vmul.f32 10.499999, %v1144_v34  ;;  %v3705_v34 = vld [vmem:[#allocation16_spill] sm:$0xff]  ;;  %v3707_v40 = vsub.f32 %v2924_v8, %v3044_v35  ;;  %vm3731_vm15 = vmmov %vm3682_vm0 }
 0x51b   :  { %v1079_v8 = vmul.f32 %v3309_v52, %v3130_v48  ;;  %v3712_v52 = vsub.f32 %v3705_v34, %v3023_v22 }
 0x51c   :  { %v1020_v39 = vpop.permute.xlu0 %1019  ;;  %v1022_v60 = vpop.permute.xlu1 %1021  ;;  %1193 = vrot.lane.b32.xlu1 %v3364_v29, %s2328_s26  ;;  %v1145_v13 = vadd.f32 %v1131_v56, %v1075_v43  ;;  %v1146_v28 = vadd.f32 %v1132_v42, %v1076_v41  ;;  %v3706_v41 = vsub.f32 %v3705_v34, %v2815_v47  ;;  %v1080_v56 = vmul.f32 %v3311_v55, %v3034_v3 }
 0x51d   :  { %v1042_v18 = vsel %vm3698_vm13, %v1018_v57, %v1020_v39  ;;  %v1043_v62 = vsel %vm3699_vm2, %v1020_v39, %v1022_v60  ;;  %v1072_v57 = vmul.f32 %v988_v5, %v2958_v21  ;;  %v3704_v5 = vsub.f32 %v2939_v1, %v2857_v25  ;;  %vm3736_vm13 = vmmov %vm3682_vm0 }
 0x51e   :  { %v1126_v50 = vmul.f32 %v3700_v7, %v1042_v18  ;;  %v1127_v37 = vmul.f32 %v3701_v15, %v1043_v62  ;;  %v3378_v38 = vmul.f32 10.499999, %v1145_v13  ;;  %v3380_v17 = vmul.f32 10.499999, %v1146_v28  ;;  %vm3738_vm2 = vmmov %vm3682_vm0 }
 0x51f   :  { %v3711_v7 = vsub.f32 %v2939_v1, %v3044_v35 }
 0x520   :  { %v1024_v23 = vpop.permute.xlu0 %1023  ;;  %1195 = vrot.lane.b32.xlu0 %v3378_v38, %s2328_s26  ;;  %v1034_v33 = vpop.permute.xlu1 %1033  ;;  %1197 = vrot.lane.b32.xlu1 %v3380_v17, %s2328_s26  ;;  %v1140_v26 = vadd.f32 %v1126_v50, %v1070_v46  ;;  %v1141_v45 = vadd.f32 %v1127_v37, %v1071_v63 }
 0x521   :  { %v1044_v54 = vsel %vm3702_vm4, %v1022_v60, %v1024_v23  ;;  %v1065_v51 = vsel %vm212_vm7, %v1024_v23, 0.0  ;;  %v1048_v36 = vsel %vm3703_vm5, %v1032_v49, %v1034_v33  ;;  %v1078_v49 = vmul.f32 %v3304_v19, %v3111_v14  ;;  %v566_v23 = vld [vmem:[#allocation7 + $0x80] sm:$0xff]  ;;  %vm3740_vm4 = vmmov %vm3682_vm0 }
 0x522   :  { %v1128_v61 = vmul.f32 %v3704_v5, %v1044_v54  ;;  %v1129_v10 = vmul.f32 %v3706_v41, %v1065_v51  ;;  %v1133_v43 = vmul.f32 %v3707_v40, %v1048_v36  ;;  %v3403_v12 = vmul.f32 10.499999, %v1140_v26  ;;  %v550_v26 = vld [vmem:[#allocation7] sm:$0xff]  ;;  %v551_v36 = vld [vmem:[#allocation7 + $0x8] sm:$0xff]  ;;  %v569_v5 = vld [vmem:[#allocation7 + $0x98] sm:$0xff] }
 0x523   :  { %v3407_v53 = vmul.f32 10.499999, %v1141_v45  ;;  %v3710_v19 = vsub.f32 %v2935_v9, %v3044_v35  ;;  %v568_v45 = vld [vmem:[#allocation7 + $0x90] sm:$0xff]  ;;  %v1980_v34 = vpack.c.bf16 %v551_v36, %v550_v26  ;;  %v553_v40 = vld [vmem:[#allocation7 + $0x18] sm:$0xff]  ;;  %v579_v36 = vld [vmem:[#allocation7 + $0xe8] sm:$0xff] }
 0x524   :  { %v1036_v42 = vpop.permute.xlu0 %1035  ;;  %1185 = vrot.lane.b32.xlu0 %v3403_v12, %s2328_s26  ;;  %v1038_v39 = vpop.permute.xlu1 %1037  ;;  %v1142_v60 = vadd.f32 %v1128_v61, %v1072_v57  ;;  %v1143_v13 = vadd.f32 %v1129_v10, %v1073_v44  ;;  %v1147_v28 = vadd.f32 %v1133_v43, %v1077_v0  ;;  %v1982_v41 = vpack.c.bf16 %v569_v5, %v568_v45  ;;  %v552_v10 = vld [vmem:[#allocation7 + $0x10] sm:$0xff]  ;;  %v570_v43 = vld [vmem:[#allocation7 + $0xa0] sm:$0xff]  ;;  %v561_v26 = vld [vmem:[#allocation7 + $0x58] sm:$0xff] }
 0x525   :  { %v1049_v46 = vsel %vm3708_vm6, %v1034_v33, %v1036_v42  ;;  %v1050_v55 = vsel %vm3709_vm14, %v1036_v42, %v1038_v39  ;;  %v1066_v18 = vsel %vm212_vm7, %v1038_v39, 0.0  ;;  %1187 = vrot.lane.b32.xlu1 %v3407_v53, %s2328_s26  ;;  %v567_v33 = vld [vmem:[#allocation7 + $0x88] sm:$0xff]  ;;  %v554_v39 = vld [vmem:[#allocation7 + $0x20] sm:$0xff]  ;;  %vm3742_vm5 = vmmov %vm3682_vm0 }
 0x526   :  { %v1134_v62 = vmul.f32 %v3710_v19, %v1049_v46  ;;  %v1135_v50 = vmul.f32 %v3711_v7, %v1050_v55  ;;  %v1136_v15 = vmul.f32 %v3712_v52, %v1066_v18  ;;  %v3429_v37 = vmul.f32 10.499999, %v1142_v60  ;;  %v555_v60 = vld [vmem:[#allocation7 + $0x28] sm:$0xff]  ;;  %v556_v55 = vld [vmem:[#allocation7 + $0x30] sm:$0xff]  ;;  %v557_v18 = vld [vmem:[#allocation7 + $0x38] sm:$0xff] }
 0x527   :  { %v3431_v0 = vmul.f32 10.499999, %v1143_v13  ;;  %v3437_v9 = vmul.f32 10.499999, %v1147_v28  ;;  %v1978_v51 = vpack.c.bf16 %v567_v33, %v566_v23  ;;  %v572_v13 = vld [vmem:[#allocation7 + $0xb0] sm:$0xff]  ;;  %v573_v28 = vld [vmem:[#allocation7 + $0xb8] sm:$0xff]  ;;  %v1992_v7 = vpack.c.bf16 %v557_v18, %v556_v55 }
 0x528   :  { %1189 = vrot.lane.b32.xlu0 %v3429_v37, %s2328_s26  ;;  %v1148_v63 = vadd.f32 %v1134_v62, %v1078_v49  ;;  %v1149_v57 = vadd.f32 %v1135_v50, %v1079_v8  ;;  %v1150_v44 = vadd.f32 %v1136_v15, %v1080_v56  ;;  %v571_v56 = vld [vmem:[#allocation7 + $0xa8] sm:$0xff]  ;;  %v1984_v49 = vpack.c.bf16 %v553_v40, %v552_v10  ;;  %v574_v19 = vld [vmem:[#allocation7 + $0xc0] sm:$0xff]  ;;  %v560_v33 = vld [vmem:[#allocation7 + $0x50] sm:$0xff] }
 0x529   :  { %1191 = vrot.lane.b32.xlu1 %v3431_v0, %s2328_s26  ;;  %1979 = vmatprep.subr.bf16.mxu1 %v1978_v51  ;;  %v1986_v42 = vpack.c.bf16 %v571_v56, %v570_v43  ;;  %v1988_v8 = vpack.c.bf16 %v555_v60, %v554_v39  ;;  %v1990_v46 = vpack.c.bf16 %v573_v28, %v572_v13  ;;  %v575_v62 = vld [vmem:[#allocation7 + $0xc8] sm:$0xff]  ;;  %v558_v52 = vld [vmem:[#allocation7 + $0x40] sm:$0xff]  ;;  %v580_v43 = vld [vmem:[#allocation7 + $0xf0] sm:$0xff] }
 0x52a   :  { %v3439_v1 = vmul.f32 10.499999, %v1148_v63  ;;  %v3445_v54 = vmul.f32 10.499999, %v1149_v57  ;;  %v3447_v61 = vmul.f32 10.499999, %v1150_v44  ;;  %1981 = vmatpush3.bf16.msra.mxu1 %v1980_v34  ;;  %v1994_v50 = vpack.c.bf16 %v575_v62, %v574_v19 }
 0x52b   :  { %1983 = vmatprep.subr.bf16.mxu1 %v1982_v41  ;;  %v559_v15 = vld [vmem:[#allocation7 + $0x48] sm:$0xff]  ;;  %v576_v63 = vld [vmem:[#allocation7 + $0xd0] sm:$0xff]  ;;  %v577_v57 = vld [vmem:[#allocation7 + $0xd8] sm:$0xff]  ;;  %v2000_v45 = vpack.c.bf16 %v561_v26, %v560_v33 }
 0x52c   :  { %1199 = vrot.lane.b32.xlu0 %v3437_v9, %s2328_s26  ;;  %v1996_v44 = vpack.c.bf16 %v559_v15, %v558_v52  ;;  %v1998_v23 = vpack.c.bf16 %v577_v57, %v576_v63  ;;  %v578_v51 = vld [vmem:[#allocation7 + $0xe0] sm:$0xff]  ;;  %v563_v41 = vld [vmem:[#allocation7 + $0x68] sm:$0xff]  ;;  %v581_v56 = vld [vmem:[#allocation7 + $0xf8] sm:$0xff]  ;;  %v1236_v52 = vmul.f32 %v3339_v27, %v2885_v31 }
 0x52d   :  { %1201 = vrot.lane.b32.xlu1 %v3439_v1, %s2328_s26  ;;  %v2002_v5 = vpack.c.bf16 %v579_v36, %v578_v51  ;;  %v562_v34 = vld [vmem:[#allocation7 + $0x60] sm:$0xff]  ;;  %v2006_v39 = vpack.c.bf16 %v581_v56, %v580_v43  ;;  %v565_v60 = vld [vmem:[#allocation7 + $0x78] sm:$0xff]  ;;  %v3716_v15 = vld [vmem:[#allocation19_spill] sm:$0xff] }
 0x52e   :  { %1985 = vmatpush3.bf16.msra.mxu1 %v1984_v49  ;;  %v2004_v10 = vpack.c.bf16 %v563_v41, %v562_v34  ;;  %v564_v49 = vld [vmem:[#allocation7 + $0x70] sm:$0xff]  ;;  %v3714_v55 = vld [vmem:[#allocation18_spill] sm:$0xff]  ;;  %v3717_v63 = vsub.f32 %v3716_v15, %v2857_v25  ;;  %v631_v51 = vld [vmem:[#allocation7 + $0x288] sm:$0xff] }
 0x52f   :  { %1987 = vmatprep.subr.bf16.mxu1 %v1986_v42  ;;  %v2008_v28 = vpack.c.bf16 %v565_v60, %v564_v49  ;;  %v3715_v18 = vsub.f32 %v3714_v55, %v2857_v25  ;;  %v630_v26 = vld [vmem:[#allocation7 + $0x280] sm:$0xff]  ;;  %v632_v31 = vld [vmem:[#allocation7 + $0x290] sm:$0xff]  ;;  %v633_v27 = vld [vmem:[#allocation7 + $0x298] sm:$0xff] }
 0x530   :  { %1203 = vrot.lane.b32.xlu0 %v3445_v54, %s2328_s26  ;;  %v614_v36 = vld [vmem:[#allocation7 + $0x200] sm:$0xff]  ;;  %v617_v43 = vld [vmem:[#allocation7 + $0x218] sm:$0xff] }
 0x531   :  { %1205 = vrot.lane.b32.xlu1 %v3447_v61, %s2328_s26  ;;  %v634_v49 = vld [vmem:[#allocation7 + $0x2a0] sm:$0xff] }
 0x532   :  { %1989 = vmatpush3.bf16.msra.mxu1 %v1988_v8  ;;  %v1235_v8 = vmul.f32 %v3335_v11, %v2881_v16 }
 0x533   :  { %1991 = vmatprep.subr.bf16.mxu1 %v1990_v46 }
 0x536   :  { %1993 = vmatpush3.bf16.msra.mxu1 %v1992_v7  ;;  %v598_v7 = vld [vmem:[#allocation7 + $0x180] sm:$0xff] }
 0x537   :  { %1995 = vmatprep.subr.bf16.mxu1 %v1994_v50  ;;  %v599_v50 = vld [vmem:[#allocation7 + $0x188] sm:$0xff] }
 0x538   :  { %v2010_v57 = vpack.c.bf16 %v599_v50, %v598_v7  ;;  %v621_v7 = vld [vmem:[#allocation7 + $0x238] sm:$0xff] }
 0x53a   :  { %1997 = vmatpush3.bf16.msra.mxu1 %v1996_v44 }
 0x53b   :  { %1999 = vmatprep.subr.bf16.mxu1 %v1998_v23 }
 0x53e   :  { %2001 = vmatpush3.bf16.msra.mxu1 %v2000_v45  ;;  %v2042_v45 = vpack.c.bf16 %v631_v51, %v630_v26  ;;  %v641_v26 = vld [vmem:[#allocation7 + $0x2d8] sm:$0xff] }
 0x53f   :  { %2003 = vmatprep.subr.bf16.mxu1 %v2002_v5  ;;  %v615_v5 = vld [vmem:[#allocation7 + $0x208] sm:$0xff] }
 0x540   :  { %v2044_v41 = vpack.c.bf16 %v615_v5, %v614_v36  ;;  %2043 = vmatprep.subr.bf16.mxu0 %v2042_v45  ;;  %v624_v36 = vld [vmem:[#allocation7 + $0x250] sm:$0xff]  ;;  %v625_v45 = vld [vmem:[#allocation7 + $0x258] sm:$0xff] }
 0x542   :  { %2005 = vmatpush3.bf16.msra.mxu1 %v2004_v10  ;;  %2045 = vmatpush3.bf16.msra.mxu0 %v2044_v41  ;;  %v616_v10 = vld [vmem:[#allocation7 + $0x210] sm:$0xff]  ;;  %v2064_v41 = vpack.c.bf16 %v625_v45, %v624_v36  ;;  %v629_v45 = vld [vmem:[#allocation7 + $0x278] sm:$0xff] }
 0x543   :  { %2007 = vmatprep.subr.bf16.mxu1 %v2006_v39  ;;  %v2048_v56 = vpack.c.bf16 %v617_v43, %v616_v10  ;;  %v618_v39 = vld [vmem:[#allocation7 + $0x220] sm:$0xff]  ;;  %v1242_v10 = vmul.f32 %v3364_v29, %v3083_v32  ;;  %v3720_v43 = vsub.f32 %v3714_v55, %v3044_v35  ;;  %v627_v32 = vld [vmem:[#allocation7 + $0x268] sm:$0xff] }
 0x546   :  { %2009 = vmatpush3.bf16.msra.mxu1 %v2008_v28 }
 0x547   :  { %2011 = vmatprep.subr.bf16.mxu1 %v2010_v57  ;;  %v623_v57 = vld [vmem:[#allocation7 + $0x248] sm:$0xff] }
 0x571   :  { %v1180_v40 = vpop.permute.xlu0 %1179 }
 0x573   :  { %v1182_v42 = vpop.permute.xlu1 %1181 }
 0x574   :  { %v1207_v13 = vsel %vm3713_vm8, %v1180_v40, %v1182_v42  ;;  %v2046_v40 = vpack.c.bf16 %v633_v27, %v632_v31 }
 0x575   :  { %v3456_v46 = vpop.permute.xlu0 %1183  ;;  %v1291_v19 = vmul.f32 %v3715_v18, %v1207_v13  ;;  %v619_v13 = vld [vmem:[#allocation7 + $0x228] sm:$0xff]  ;;  %v637_v18 = vld [vmem:[#allocation7 + $0x2b8] sm:$0xff] }
 0x576   :  { %v1208_v62 = vsel %vm3682_vm0, %v1182_v42, %v3456_v46  ;;  %2047 = vmatprep.subr.bf16.mxu0 %v2046_v40  ;;  %v635_v42 = vld [vmem:[#allocation7 + $0x2a8] sm:$0xff]  ;;  %v2052_v28 = vpack.c.bf16 %v619_v13, %v618_v39  ;;  %v1243_v40 = vmul.f32 %v3378_v38, %v3090_v59  ;;  %v642_v39 = vld [vmem:[#allocation7 + $0x2e0] sm:$0xff]  ;;  %v1237_v59 = vmul.f32 %v3341_v20, %v2900_v4 }
 0x577   :  { %v1292_v16 = vmul.f32 %v3717_v63, %v1208_v62  ;;  %v1305_v11 = vadd.f32 %v1291_v19, %v1235_v8  ;;  %2049 = vmatpush3.bf16.msra.mxu0 %v2048_v56  ;;  %v2050_v60 = vpack.c.bf16 %v635_v42, %v634_v49  ;;  %v636_v8 = vld [vmem:[#allocation7 + $0x2b0] sm:$0xff]  ;;  %v639_v63 = vld [vmem:[#allocation7 + $0x2c8] sm:$0xff]  ;;  %v3721_v49 = vsub.f32 %v3716_v15, %v3044_v35 }
 0x578   :  { %v620_v19 = vld [vmem:[#allocation7 + $0x230] sm:$0xff]  ;;  %v2054_v62 = vpack.c.bf16 %v637_v18, %v636_v8 }
 0x579   :  { %v1306_v44 = vadd.f32 %v1292_v16, %v1236_v52  ;;  %v1319_v23 = vmul.f32 6.9999995, %v1305_v11  ;;  %2051 = vmatprep.subr.bf16.mxu0 %v2050_v60  ;;  %v2056_v50 = vpack.c.bf16 %v621_v7, %v620_v19  ;;  %v638_v52 = vld [vmem:[#allocation7 + $0x2c0] sm:$0xff]  ;;  %v643_v60 = vld [vmem:[#allocation7 + $0x2e8] sm:$0xff]  ;;  %v3723_v7 = vld [vmem:[#allocation20_spill] sm:$0xff] }
 0x57a   :  { %v622_v16 = vld [vmem:[#allocation7 + $0x240] sm:$0xff]  ;;  %v2058_v11 = vpack.c.bf16 %v639_v63, %v638_v52  ;;  %v2066_v18 = vpack.c.bf16 %v643_v60, %v642_v39  ;;  %v3734_v39 = vld [vmem:[#allocation17_spill] sm:$0xff] }
 0x57b   :  { %v1320_v33 = vmul.f32 6.9999995, %v1306_v44  ;;  %2053 = vmatpush3.bf16.msra.mxu0 %v2052_v28  ;;  %v2060_v44 = vpack.c.bf16 %v623_v57, %v622_v16  ;;  %v626_v19 = vld [vmem:[#allocation7 + $0x260] sm:$0xff]  ;;  %v1238_v16 = vmul.f32 %v3403_v12, %v2907_v6  ;;  %v645_v57 = vld [vmem:[#allocation7 + $0x2f8] sm:$0xff]  ;;  %v3735_v60 = vsub.f32 %v3734_v39, %v2815_v47 }
 0x57c   :  { %2055 = vmatprep.subr.bf16.mxu0 %v2054_v62  ;;  %v2068_v55 = vpack.c.bf16 %v627_v32, %v626_v19 }
 0x57d   :  { %v2168_v34 = vpack.i.bf16 %v1320_v33, %v1319_v23  ;;  %v640_v33 = vld [vmem:[#allocation7 + $0x2d0] sm:$0xff] }
 0x57e   :  { %v2062_v51 = vpack.c.bf16 %v641_v26, %v640_v33 }
 0x57f   :  { %2169 = vrot.lane.b32.xlu0 %v2168_v34, %s2320_s5  ;;  %2057 = vmatpush3.bf16.msra.mxu0 %v2056_v50  ;;  %v3724_v50 = vsub.f32 %v3723_v7, %v2857_v25 }
 0x580   :  { %2059 = vmatprep.subr.bf16.mxu0 %v2058_v11  ;;  %v3726_v11 = vld [vmem:[#allocation21_spill] sm:$0xff] }
 0x581   :  { %v3727_v4 = vsub.f32 %v3726_v11, %v2857_v25 }
 0x583   :  { %2061 = vmatpush3.bf16.msra.mxu0 %v2060_v44  ;;  %v628_v44 = vld [vmem:[#allocation7 + $0x270] sm:$0xff] }
 0x584   :  { %2063 = vmatprep.subr.bf16.mxu0 %v2062_v51 }
 0x587   :  { %2065 = vmatpush3.bf16.msra.mxu0 %v2064_v41 }
 0x588   :  { %2067 = vmatprep.subr.bf16.mxu0 %v2066_v18 }
 0x58b   :  { %2069 = vmatpush3.bf16.msra.mxu0 %v2068_v55  ;;  %v1245_v55 = vmul.f32 %v3437_v9, %v3068_v2 }
 0x58e   :  { %v1194_v23 = vpop.permute.xlu1 %1193 }
 0x592   :  { %v1196_v5 = vpop.permute.xlu0 %1195  ;;  %v1198_v34 = vpop.permute.xlu1 %1197 }
 0x593   :  { %v1213_v31 = vsel %vm3718_vm9, %v1194_v23, %v1196_v5  ;;  %v1214_v27 = vsel %vm3719_vm1, %v1196_v5, %v1198_v34  ;;  %v1239_v23 = vmul.f32 %v3407_v53, %v2931_v58  ;;  %v1240_v5 = vmul.f32 %v3429_v37, %v2958_v21 }
 0x594   :  { %v1298_v56 = vmul.f32 %v3720_v43, %v1213_v31  ;;  %v1299_v42 = vmul.f32 %v3721_v49, %v1214_v27  ;;  %v2072_v31 = vpack.c.bf16 %v629_v45, %v628_v44  ;;  %v1241_v21 = vmul.f32 %v3431_v0, %v2831_v30 }
 0x595   :  { %v1244_v30 = vmul.f32 %v3380_v17, %v3064_v24  ;;  %v1246_v24 = vmul.f32 %v3439_v1, %v3111_v14  ;;  %v1248_v14 = vmul.f32 %v3447_v61, %v3034_v3 }
 0x596   :  { %v1312_v13 = vadd.f32 %v1298_v56, %v1242_v10  ;;  %v1313_v28 = vadd.f32 %v1299_v42, %v1243_v40  ;;  %v1186_v8 = vpop.permute.xlu0 %1185  ;;  %v3729_v10 = vld [vmem:[#allocation22_spill] sm:$0xff]  ;;  %v3732_v56 = vld [vmem:[#allocation23_spill] sm:$0xff] }
 0x597   :  { %v1209_v29 = vsel %vm3722_vm10, %v3456_v46, %v1186_v8  ;;  %v1188_v38 = vpop.permute.xlu1 %1187  ;;  %v644_v46 = vld [vmem:[#allocation7 + $0x2f0] sm:$0xff]  ;;  %v3730_v40 = vsub.f32 %v3729_v10, %v2857_v25  ;;  %v3733_v49 = vsub.f32 %v3732_v56, %v2857_v25  ;;  %v3737_v25 = vsub.f32 %v3723_v7, %v3044_v35 }
 0x598   :  { %v1326_v62 = vmul.f32 6.9999995, %v1312_v13  ;;  %v1327_v15 = vmul.f32 6.9999995, %v1313_v28  ;;  %v1293_v52 = vmul.f32 %v3724_v50, %v1209_v29  ;;  %v1210_v63 = vsel %vm3725_vm11, %v1186_v8, %v1188_v38 }
 0x599   :  { %v1294_v20 = vmul.f32 %v3727_v4, %v1210_v63  ;;  %v2070_v36 = vpack.c.bf16 %v645_v57, %v644_v46  ;;  %v1247_v7 = vmul.f32 %v3445_v54, %v3130_v48  ;;  %v3743_v48 = vsub.f32 %v3732_v56, %v3044_v35  ;;  %v601_v56 = vld [vmem:[#allocation7 + $0x198] sm:$0xff] }
 0x59a   :  { %v1307_v33 = vadd.f32 %v1293_v52, %v1237_v59  ;;  %v1190_v26 = vpop.permute.xlu0 %1189  ;;  %v2173_v51 = vpack.i.bf16 %v1327_v15, %v1326_v62  ;;  %v3739_v15 = vsub.f32 %v3726_v11, %v3044_v35  ;;  %v3741_v11 = vsub.f32 %v3729_v10, %v3044_v35  ;;  %v3745_v35 = vld [vmem:[#allocation14_spill] sm:$0xff] }
 0x59b   :  { %v1308_v6 = vadd.f32 %v1294_v20, %v1238_v16  ;;  %v1211_v12 = vsel %vm3728_vm12, %v1188_v38, %v1190_v26  ;;  %v1192_v41 = vpop.permute.xlu1 %1191  ;;  %2071 = vmatprep.subr.bf16.mxu0 %v2070_v36  ;;  %v3744_v57 = vsub.f32 %v3734_v39, %v3023_v22  ;;  %v1333_v22 = vsub.f32 0.0, %v3745_v35 }
 0x59c   :  { %v1321_v27 = vmul.f32 6.9999995, %v1307_v33  ;;  %v1295_v43 = vmul.f32 %v3730_v40, %v1211_v12  ;;  %v1212_v58 = vsel %vm3731_vm15, %v1190_v26, %v1192_v41  ;;  %v1233_v53 = vsel %vm212_vm7, %v1192_v41, 0.0  ;;  %2174 = vrot.lane.b32.xlu1 %v2173_v51, %s2320_s5  ;;  %2073 = vmatpush3.bf16.msra.mxu0 %v2072_v31 }
 0x59d   :  { %v1322_v37 = vmul.f32 6.9999995, %v1308_v6  ;;  %v1296_v42 = vmul.f32 %v3733_v49, %v1212_v58  ;;  %v1297_v13 = vmul.f32 %v3735_v60, %v1233_v53  ;;  %v1335_v12 = vmul.f32 1.442695, %v1333_v22  ;;  %v582_v58 = vld [vmem:[#allocation7 + $0x100] sm:$0xff]  ;;  %v583_v53 = vld [vmem:[#allocation7 + $0x108] sm:$0xff] }
 0x59e   :  { %v1309_v28 = vadd.f32 %v1295_v43, %v1239_v23  ;;  %v1200_v8 = vpop.permute.xlu0 %1199  ;;  %v2012_v60 = vpack.c.bf16 %v583_v53, %v582_v58  ;;  %v648_v53 = vld [vmem:[#allocation7 + $0x310] sm:$0xff] }
 0x59f   :  { %v1310_v18 = vadd.f32 %v1296_v42, %v1240_v5  ;;  %v1311_v19 = vadd.f32 %v1297_v13, %v1241_v21  ;;  %v1215_v32 = vsel %vm3736_vm13, %v1198_v34, %v1200_v8  ;;  %v1202_v59 = vpop.permute.xlu1 %1201  ;;  %v2178_v29 = vpack.i.bf16 %v1322_v37, %v1321_v27  ;;  %v3746_v27 = vld [vmem:[#allocation15_spill] sm:$0xff]  ;;  %v600_v37 = vld [vmem:[#allocation7 + $0x190] sm:$0xff] }
 0x5a0   :  { %v1323_v0 = vmul.f32 6.9999995, %v1309_v28  ;;  %v1300_v38 = vmul.f32 %v3737_v25, %v1215_v32  ;;  %v1216_v47 = vsel %vm3738_vm2, %v1200_v8, %v1202_v59  ;;  %2211 = vpow2.f32 %v1335_v12  ;;  %v602_v32 = vld [vmem:[#allocation7 + $0x1a0] sm:$0xff]  ;;  %v587_v25 = vld [vmem:[#allocation7 + $0x128] sm:$0xff] }
 0x5a1   :  { %v1324_v62 = vmul.f32 6.9999995, %v1310_v18  ;;  %v1301_v34 = vmul.f32 %v3739_v15, %v1216_v47  ;;  %2179 = vrot.lane.b32.xlu0 %v2178_v29, %s2320_s5  ;;  %v1325_v45 = vmul.f32 6.9999995, %v1311_v19  ;;  %v1334_v10 = vsub.f32 0.0, %v3746_v27  ;;  %v584_v18 = vld [vmem:[#allocation7 + $0x110] sm:$0xff] }
 0x5a2   :  { %v1314_v17 = vadd.f32 %v1300_v38, %v1244_v30  ;;  %v1204_v50 = vpop.permute.xlu0 %1203  ;;  %v2014_v8 = vpack.c.bf16 %v601_v56, %v600_v37  ;;  %v585_v19 = vld [vmem:[#allocation7 + $0x118] sm:$0xff]  ;;  %v604_v38 = vld [vmem:[#allocation7 + $0x1b0] sm:$0xff] }
 0x5a3   :  { %v1315_v52 = vadd.f32 %v1301_v34, %v1245_v55  ;;  %v1217_v63 = vsel %vm3740_vm4, %v1202_v59, %v1204_v50  ;;  %v1206_v16 = vpop.permute.xlu1 %1205  ;;  %v2183_v2 = vpack.i.bf16 %v1324_v62, %v1323_v0  ;;  %v1337_v40 = vmul.f32 1.442695, %v1334_v10  ;;  %v603_v59 = vld [vmem:[#allocation7 + $0x1a8] sm:$0xff]  ;;  %v586_v0 = vld [vmem:[#allocation7 + $0x120] sm:$0xff]  ;;  %v605_v47 = vld [vmem:[#allocation7 + $0x1b8] sm:$0xff] }
 0x5a4   :  { %v1328_v9 = vmul.f32 6.9999995, %v1314_v17  ;;  %v1302_v4 = vmul.f32 %v3741_v11, %v1217_v63  ;;  %v1218_v20 = vsel %vm3742_vm5, %v1204_v50, %v1206_v16  ;;  %v1234_v46 = vsel %vm212_vm7, %v1206_v16, 0.0  ;;  %v588_v34 = vld [vmem:[#allocation7 + $0x130] sm:$0xff]  ;;  %v606_v17 = vld [vmem:[#allocation7 + $0x1c0] sm:$0xff]  ;;  %v607_v50 = vld [vmem:[#allocation7 + $0x1c8] sm:$0xff] }
 0x5a5   :  { %v1329_v1 = vmul.f32 6.9999995, %v1315_v52  ;;  %v1303_v54 = vmul.f32 %v3743_v48, %v1218_v20  ;;  %v1304_v44 = vmul.f32 %v3744_v57, %v1234_v46  ;;  %2184 = vrot.lane.b32.xlu1 %v2183_v2, %s2320_s5  ;;  %v2016_v29 = vpack.c.bf16 %v585_v19, %v584_v18  ;;  %v590_v16 = vld [vmem:[#allocation7 + $0x140] sm:$0xff]  ;;  %v591_v2 = vld [vmem:[#allocation7 + $0x148] sm:$0xff]  ;;  %v609_v11 = vld [vmem:[#allocation7 + $0x1d8] sm:$0xff] }
 0x5a6   :  { %v1316_v23 = vadd.f32 %v1302_v4, %v1246_v24  ;;  %v2018_v30 = vpack.c.bf16 %v603_v59, %v602_v32  ;;  %v2020_v62 = vpack.c.bf16 %v587_v25, %v586_v0  ;;  %v2022_v15 = vpack.c.bf16 %v605_v47, %v604_v38  ;;  %v589_v24 = vld [vmem:[#allocation7 + $0x138] sm:$0xff]  ;;  %v592_v46 = vld [vmem:[#allocation7 + $0x150] sm:$0xff]  ;;  %v611_v48 = vld [vmem:[#allocation7 + $0x1e8] sm:$0xff] }
 0x5a7   :  { %v1317_v33 = vadd.f32 %v1303_v54, %v1247_v7  ;;  %v1318_v26 = vadd.f32 %v1304_v44, %v1248_v14  ;;  %v2188_v51 = vpack.i.bf16 %v1329_v1, %v1328_v9  ;;  %v2024_v52 = vpack.c.bf16 %v589_v24, %v588_v34  ;;  %v608_v9 = vld [vmem:[#allocation7 + $0x1d0] sm:$0xff]  ;;  %v593_v14 = vld [vmem:[#allocation7 + $0x158] sm:$0xff]  ;;  %v610_v1 = vld [vmem:[#allocation7 + $0x1e0] sm:$0xff] }
 0x5a8   :  { %v1330_v36 = vmul.f32 6.9999995, %v1316_v23  ;;  %v2026_v63 = vpack.c.bf16 %v607_v50, %v606_v17  ;;  %v2028_v4 = vpack.c.bf16 %v591_v2, %v590_v16  ;;  %v2030_v20 = vpack.c.bf16 %v609_v11, %v608_v9  ;;  %v594_v44 = vld [vmem:[#allocation7 + $0x160] sm:$0xff]  ;;  %v595_v23 = vld [vmem:[#allocation7 + $0x168] sm:$0xff]  ;;  %v649_v37 = vld [vmem:[#allocation7 + $0x318] sm:$0xff] }
 0x5a9   :  { %v1331_v5 = vmul.f32 6.9999995, %v1317_v33  ;;  %v1332_v6 = vmul.f32 6.9999995, %v1318_v26  ;;  %2189 = vrot.lane.b32.xlu0 %v2188_v51, %s2320_s5  ;;  %v2032_v54 = vpack.c.bf16 %v593_v14, %v592_v46  ;;  %v2034_v57 = vpack.c.bf16 %v611_v48, %v610_v1  ;;  %v612_v33 = vld [vmem:[#allocation7 + $0x1f0] sm:$0xff]  ;;  %v613_v26 = vld [vmem:[#allocation7 + $0x1f8] sm:$0xff] }
 0x5aa   :  { %v2212_v41 = vpop.eup %2211  ;;  %v2036_v51 = vpack.c.bf16 %v595_v23, %v594_v44  ;;  %v653_v0 = vld [vmem:[#allocation7 + $0x338] sm:$0xff]  ;;  %v654_v34 = vld [vmem:[#allocation7 + $0x340] sm:$0xff]  ;;  %v655_v24 = vld [vmem:[#allocation7 + $0x348] sm:$0xff] }
 0x5ab   :  { %v2193_v3 = vpack.i.bf16 %v1331_v5, %v1330_v36  ;;  %v2198_v61 = vpack.i.bf16 %v1332_v6, %v1325_v45  ;;  %v1339_v31 = vadd.f32 1.0, %v2212_v41  ;;  %v2038_v45 = vpack.c.bf16 %v613_v26, %v612_v33  ;;  %v596_v5 = vld [vmem:[#allocation7 + $0x170] sm:$0xff]  ;;  %v597_v6 = vld [vmem:[#allocation7 + $0x178] sm:$0xff]  ;;  %v659_v46 = vld [vmem:[#allocation7 + $0x368] sm:$0xff] }
 0x5ac   :  { %v2090_v2 = vpack.c.bf16 %v655_v24, %v654_v34  ;;  %v656_v9 = vld [vmem:[#allocation7 + $0x350] sm:$0xff]  ;;  %v657_v11 = vld [vmem:[#allocation7 + $0x358] sm:$0xff] }
 0x5ad   :  { %2194 = vrot.lane.b32.xlu1 %v2193_v3, %s2320_s5  ;;  %2199 = vrot.lane.b32.xlu0 %v2198_v61, %s2320_s5  ;;  %2213 = vrcp.f32 %v1339_v31  ;;  %v646_v61 = vld [vmem:[#allocation7 + $0x300] sm:$0xff]  ;;  %v2040_v31 = vpack.c.bf16 %v597_v6, %v596_v5  ;;  %v660_v1 = vld [vmem:[#allocation7 + $0x370] sm:$0xff]  ;;  %v661_v48 = vld [vmem:[#allocation7 + $0x378] sm:$0xff] }
 0x5ae   :  { %2215 = vpow2.f32 %v1337_v40 }
 0x5b7   :  { %v2214_v43 = vpop.eup %2213 }
 0x5b8   :  { %v1345_v39 = vmul.f32 %v2214_v43, %v3745_v35  ;;  %v2216_v55 = vpop.eup %2215  ;;  %v647_v35 = vld [vmem:[#allocation7 + $0x308] sm:$0xff] }
 0x5b9   :  { %v1340_v7 = vadd.f32 1.0, %v2216_v55  ;;  %v2074_v43 = vpack.c.bf16 %v647_v35, %v646_v61 }
 0x5bb   :  { %2217 = vrcp.f32 %v1340_v7 }
 0x5c5   :  { %v2218_v36 = vpop.eup %2217 }
 0x5c6   :  { %v1346_v41 = vmul.f32 %v2218_v36, %v3746_v27 }
 0x5f1   :  { %v3550_v21 = vpop.permute.xlu0 %2169 }
 0x5f2   :  { %v2172_v49 = vunpack.i.h.bf16 %v3550_v21  ;;  %v2171_v42 = vunpack.i.l.bf16 %v3550_v21  ;;  %v652_v21 = vld [vmem:[#allocation7 + $0x330] sm:$0xff] }
 0x5f3   :  { %v2086_v55 = vpack.c.bf16 %v653_v0, %v652_v21 }
 0x5f4   :  { %v1389_v13 = vsel %vm200_vm3, %v2171_v42, %v2172_v49  ;;  %v1415_v28 = vsel %vm200_vm3, %v1345_v39, %v2171_v42 }
 0x5f5   :  { %1481 = vmatprep.mubr.f32.mxu1 %v1389_v13 }
 0x5f6   :  { %1482 = vmatmul.mubr.f32.vlgmr.msra.gmra.mrb[0].mxu1 %v1415_v28  ;;  %v650_v28 = vld [vmem:[#allocation7 + $0x320] sm:$0xff] }
 0x5f7   :  { %2013 = vmatpush3.bf16.msra.mxu1 %v2012_v60  ;;  %v2078_v60 = vpack.c.bf16 %v649_v37, %v648_v53 }
 0x5f8   :  { %2015 = vmatprep.subr.bf16.mxu1 %v2014_v8  ;;  %v651_v8 = vld [vmem:[#allocation7 + $0x328] sm:$0xff] }
 0x5fb   :  { %2017 = vmatpush3.bf16.msra.mxu1 %v2016_v29  ;;  %v2082_v29 = vpack.c.bf16 %v651_v8, %v650_v28  ;;  %v3748_v28 = vld [vmem:[#allocation13_spill] sm:$0xff] }
 0x5fc   :  { %2019 = vmatprep.subr.bf16.mxu1 %v2018_v30 }
 0x5ff   :  { %2021 = vmatpush3.bf16.msra.mxu1 %v2020_v62 }
 0x600   :  { %2023 = vmatprep.subr.bf16.mxu1 %v2022_v15 }
 0x603   :  { %2025 = vmatpush3.bf16.msra.mxu1 %v2024_v52 }
 0x604   :  { %2027 = vmatprep.subr.bf16.mxu1 %v2026_v63 }
 0x607   :  { %2029 = vmatpush3.bf16.msra.mxu1 %v2028_v4  ;;  %v2094_v4 = vpack.c.bf16 %v657_v11, %v656_v9 }
 0x608   :  { %2031 = vmatprep.subr.bf16.mxu1 %v2030_v20  ;;  %v658_v20 = vld [vmem:[#allocation7 + $0x360] sm:$0xff] }
 0x609   :  { %v2098_v14 = vpack.c.bf16 %v659_v46, %v658_v20 }
 0x60b   :  { %2033 = vmatpush3.bf16.msra.mxu1 %v2032_v54  ;;  %v2102_v54 = vpack.c.bf16 %v661_v48, %v660_v1 }
 0x60c   :  { %2035 = vmatprep.subr.bf16.mxu1 %v2034_v57 }
 0x60e   :  { %v2175_v3 = vpop.permute.xlu1 %2174 }
 0x60f   :  { %v2177_v22 = vunpack.i.h.bf16 %v2175_v3  ;;  %v2176_v12 = vunpack.i.l.bf16 %v2175_v3  ;;  %2037 = vmatpush3.bf16.msra.mxu1 %v2036_v51 }
 0x610   :  { %2039 = vmatprep.subr.bf16.mxu1 %v2038_v45 }
 0x611   :  { %v1395_v10 = vsel %vm200_vm3, %v2176_v12, %v2177_v22  ;;  %v1416_v40 = vsel %vm200_vm3, %v1346_v41, %v2176_v12 }
 0x612   :  { %1486 = vmatprep.mubr.f32.mxu1 %v1395_v10 }
 0x613   :  { %v2180_v58 = vpop.permute.xlu0 %2179  ;;  %1487 = vmatmul.mubr.f32.gmra.mrb[2].mxu1 %v1416_v40 }
 0x614   :  { %v2182_v56 = vunpack.i.h.bf16 %v2180_v58  ;;  %v2181_v42 = vunpack.i.l.bf16 %v2180_v58  ;;  %2041 = vmatpush3.bf16.msra.mxu1 %v2040_v31 }
 0x615   :  { %2075 = vmatprep.subr.bf16.mxu1 %v2074_v43 }
 0x616   :  { %v1391_v39 = vsel %vm200_vm3, %v2181_v42, %v2182_v56  ;;  %v1390_v27 = vsel %vm200_vm3, %v2172_v49, %v2181_v42  ;;  %v662_v42 = vld [vmem:[%s3600_s6] sm:$0x3] }
 0x617   :  { %v2185_v13 = vpop.permute.xlu1 %2184  ;;  %1556 = vmatprep.mubr.f32.mxu1 %v1391_v39  ;;  %v3747_v39 = vld [vmem:[#allocation12_spill] sm:$0xff]  ;;  %v1726_v8 = vrot.slane %v662_v42, %v3748_v28 }
 0x618   :  { %v2187_v18 = vunpack.i.h.bf16 %v2185_v13  ;;  %v2186_v19 = vunpack.i.l.bf16 %v2185_v13  ;;  %1557 = vmatmul.mubr.f32.vlgmr.msra.gmra.mrb[4].mxu1 %v1390_v27  ;;  %v1720_v27 = vrot.slane %v662_v42, %v3747_v39 }
 0x619   :  { %2077 = vmatpush3.bf16.msra.mxu1 %v2074_v43 }
 0x61a   :  { %v1393_v32 = vsel %vm200_vm3, %v2186_v19, %v2187_v18  ;;  %2079 = vmatprep.subr.bf16.mxu1 %v2078_v60  ;;  %v1392_v59 = vsel %vm200_vm3, %v2182_v56, %v2186_v19 }
 0x61b   :  { %1631 = vmatprep.mubr.f32.mxu0 %v1393_v32  ;;  %v2190_v30 = vpop.permute.xlu0 %2189 }
 0x61c   :  { %v2192_v49 = vunpack.i.h.bf16 %v2190_v30  ;;  %v2191_v25 = vunpack.i.l.bf16 %v2190_v30  ;;  %1632 = vmatmul.mubr.f32.vlgmr.msra.gmra.mrb[4].mxu0 %v1392_v59 }
 0x61d   :  { %2081 = vmatpush3.bf16.msra.mxu1 %v2078_v60 }
 0x61e   :  { %v1397_v38 = vsel %vm200_vm3, %v2191_v25, %v2192_v49  ;;  %2083 = vmatprep.subr.bf16.mxu1 %v2082_v29  ;;  %v1396_v47 = vsel %vm200_vm3, %v2177_v22, %v2191_v25 }
 0x61f   :  { %v2195_v62 = vpop.permute.xlu1 %2194  ;;  %v2200_v15 = vpop.permute.xlu0 %2199  ;;  %1561 = vmatprep.mubr.f32.mxu1 %v1397_v38 }
 0x620   :  { %v2197_v17 = vunpack.i.h.bf16 %v2195_v62  ;;  %v2196_v50 = vunpack.i.l.bf16 %v2195_v62  ;;  %v2201_v7 = vunpack.i.l.bf16 %v2200_v15  ;;  %1562 = vmatmul.mubr.f32.gmra.mrb[6].mxu1 %v1396_v47  ;;  %v2202_v57 = vunpack.i.h.bf16 %v2200_v15 }
 0x621   :  { %2085 = vmatpush3.bf16.msra.mxu1 %v2082_v29 }
 0x622   :  { %v1399_v52 = vsel %vm200_vm3, %v2196_v50, %v2197_v17  ;;  %2087 = vmatprep.subr.bf16.mxu1 %v2086_v55  ;;  %v1394_v63 = vsel %vm200_vm3, %v2187_v18, %v2201_v7  ;;  %v1398_v16 = vsel %vm200_vm3, %v2192_v49, %v2196_v50  ;;  %v1400_v44 = vsel %vm200_vm3, %v2197_v17, %v2202_v57 }
 0x623   :  { %1636 = vmatprep.mubr.f32.mxu0 %v1399_v52  ;;  %1933 = vmatprep.mubr.f32.mxu1 %v1394_v63 }
 0x624   :  { %1637 = vmatmul.mubr.f32.gmra.mrb[6].mxu0 %v1398_v16 }
 0x625   :  { %2089 = vmatpush3.bf16.msra.mxu1 %v2086_v55 }
 0x626   :  { %2091 = vmatprep.subr.bf16.mxu1 %v2090_v2 }
 0x629   :  { %2093 = vmatpush3.bf16.msra.mxu1 %v2090_v2 }
 0x62a   :  { %2095 = vmatprep.subr.bf16.mxu1 %v2094_v4 }
 0x62d   :  { %2097 = vmatpush3.bf16.msra.mxu1 %v2094_v4 }
 0x62e   :  { %2099 = vmatprep.subr.bf16.mxu1 %v2098_v14 }
 0x631   :  { %2101 = vmatpush3.bf16.msra.mxu1 %v2098_v14 }
 0x632   :  { %2103 = vmatprep.subr.bf16.mxu1 %v2102_v54 }
 0x635   :  { %2105 = vmatpush3.bf16.msra.mxu1 %v2102_v54 }
 0x638   :  { %1934 = vmatmul.mubr.f32.vlgmr.msra.gmra.mrb[8].mxu1 %v1400_v44 }
 0x6c9   :  { %v1801_v23 = vpop.f32.mrb[0].mxu1 }
 0x6ca   :  { %v1802_v33 = vpop.f32.mrb[1].mxu1 }
 0x6cb   :  { %v1803_v26 = vadd.f32 %v1802_v33, %v1801_v23 }
 0x6e6   :  { %v1804_v51 = vpop.f32.mrb[2].mxu1 }
 0x6e7   :  { %v1805_v36 = vpop.f32.mrb[3].mxu1 }
 0x6e8   :  { %v1806_v45 = vadd.f32 %v1805_v36, %v1804_v51 }
 0x6eb   :  { %v1839_v5 = vpop.f32.mrb[4].mxu1 }
 0x6ec   :  { %v1840_v6 = vpop.f32.mrb[5].mxu1 }
 0x6ed   :  { %v1841_v3 = vadd.f32 %v1840_v6, %v1839_v5 }
 0x6ef   :  { %v1559_v61 = vadd.f32 %v1841_v3, %v1803_v26  ;;  %v1877_v35 = vpop.f32.mrb[4].mxu0 }
 0x6f0   :  { %v1878_v22 = vpop.f32.mrb[5].mxu0 }
 0x6f1   :  { %v1879_v12 = vadd.f32 %v1878_v22, %v1877_v35 }
 0x6f3   :  { %v1842_v41 = vpop.f32.mrb[6].mxu1  ;;  %v1634_v31 = vadd.f32 %v1879_v12, %v1559_v61 }
 0x6f4   :  { %v1843_v10 = vpop.f32.mrb[7].mxu1 }
 0x6f5   :  { %v1844_v40 = vadd.f32 %v1843_v10, %v1842_v41 }
 0x6f7   :  { %v1564_v43 = vadd.f32 %v1844_v40, %v1806_v45  ;;  %v1880_v58 = vpop.f32.mrb[6].mxu0 }
 0x6f8   :  { %v1881_v53 = vpop.f32.mrb[7].mxu0 }
 0x6f9   :  { %v1882_v37 = vadd.f32 %v1881_v53, %v1880_v58 }
 0x6fb   :  { %v1639_v56 = vadd.f32 %v1882_v37, %v1564_v43 }
 0x70b   :  { %v1935_v60 = vpop.f32.mrb[8].mxu1 }
 0x70c   :  { %v1714_v13 = vadd.f32 %v1935_v60, %v1639_v56  ;;  %v1708_v18 = vpop.f32.mrb[9].mxu1 }
 0x70d   :  { %v1709_v19 = vadd.f32 %v1708_v18, %v1634_v31 }
 0x70e   :  { %v1722_v32 = vmul.f32 %v1720_v27, %v1714_v13 }
 0x70f   :  { %v1721_v59 = vmul.f32 %v1720_v27, %v1709_v19 }
 0x710   :  { %v1728_v29 = vadd.f32 %v1726_v8, %v1722_v32 }
 0x711   :  { %v1727_v30 = vadd.f32 %v1726_v8, %v1721_v59 }
 0x712   :  { %1730 = vst [vmem:[#allocation8 + $0x8] sm:$0xff] %v1728_v29 }
 0x713   :  { %1729 = vst [vmem:[#allocation8] sm:$0xff] %v1727_v30 }
 0x714   :  { %2296 = shalt.err (!%p2293_p0)
}
 0x715   :  { %s2297_s17 = scalar_lea.hbm %s3601_s7, 256 }
 0x716   :  { %p2298_p1 = scmp.ne.s32.totalorder %s3601_s7, %s2297_s17  ;;  %p2301_p2 = scmp.lt.u32.totalorder %s2297_s17, %s3601_s7 }
 0x718   :  { %p2303_p3 = pnand %p2301_p2, %p2298_p1 }
 0x71a   :  { %2306 = shalt.err (!%p2303_p3)
}
 0x71b   :  { %1742 = dma.vmem_to_hbm [thread:$0]  %s1737_s14, 256, %s3601_s7, [#allocation4], %s2315_s4, %s2315_s4, %s2316_s23  }
 0x71c   :  { %2311 = dma.done.wait [#allocation4], 256  }
 0x71d   :  { %2312 = vsyncadd [#allocation4], 4294967040 }
 0x71e   :  { %1746 = vsyncpa [#allocation3], 1 }
 0x71f   :  { %1747 = vsyncpa [#allocation6], 1 }
 0x720   :  { %1748 = vsyncpa [#allocation4], 1 }

</bundles_post_ra>
